<compile_context>
chip_gen: v6e
topology: v6e:2x2x1
jax: 0.10.0
libtpu: 0.0.40
codegen_flags: <defaults>
</compile_context>

<pallas_src>
import functools

import jax
import jax.numpy as jnp
from jax import lax
from jax.experimental import pallas as pl
from jax.experimental.pallas import tpu as pltpu

_SQRT_2_OVER_PI = 0.7978845608028654
_VMEM_LIMIT = 48 * 1024 * 1024  # above v5e's 16MiB default, safe on v7x's 64MiB VMEM


def _round_up(x, m):
    return (x + m - 1) // m * m


def _layer_norm(x, g, b, eps):
    mean = jnp.mean(x, axis=-1, keepdims=True)
    c = x - mean
    var = jnp.mean(c * c, axis=-1, keepdims=True)
    return c * lax.rsqrt(var + eps) * g + b


def _gelu_tanh(x):
    # TODO(synk): HF LayoutLM's default hidden_act="gelu" is the exact erf GELU;
    # the tanh approximation used here (differs <~1e-3) lowers reliably in Mosaic.
    return 0.5 * x * (1.0 + jnp.tanh(_SQRT_2_OVER_PI * (x + 0.044715 * x * x * x)))


# ---------------------------------------------------------------------------
# Kernels
# ---------------------------------------------------------------------------

def _linear_kernel(x_ref, w_ref, b_ref, o_ref):
    # Fused QKV projection: (TILE_N, H)bf16 @ (H, 3H)bf16 -> f32 acc -> bf16.
    acc = jnp.dot(x_ref[...], w_ref[...], preferred_element_type=jnp.float32)
    o_ref[...] = (acc + b_ref[...]).astype(o_ref.dtype)


def _attention_kernel(q_ref, k_ref, v_ref, m_ref, o_ref, *, dh, heads, scale):
    # One (batch, head_group) tile. q/k/v blocks are (1, S, heads*dh) bf16 lane
    # slices of the (B, S, 3H) qkv buffer; mask is (1, 1, S) f32 additive.
    mask = m_ref[0]          # (1, S) f32, broadcast over query rows
    q_all = q_ref[0]         # (S, heads*dh) bf16
    k_all = k_ref[0]
    v_all = v_ref[0]
    outs = []
    for h in range(heads):   # static unrolled loop over heads in this group
        lo = h * dh
        q = q_all[:, lo:lo + dh] * scale            # scale folded into q (bf16)
        k = k_all[:, lo:lo + dh]
        v = v_all[:, lo:lo + dh]
        # QK^T without an explicit transpose of k.
        s = lax.dot_general(q, k, (((1,), (1,)), ((), ())),
                            preferred_element_type=jnp.float32)   # (S, S) f32
        s = s + mask
        s = s - jnp.max(s, axis=-1, keepdims=True)
        p = jnp.exp(s)
        inv = pl.reciprocal(jnp.sum(p, axis=-1, keepdims=True), approx=True)
        o = lax.dot_general(p.astype(v.dtype), v, (((1,), (0,)), ((), ())),
                            preferred_element_type=jnp.float32)   # (S, dh) f32
        outs.append((o * inv).astype(o_ref.dtype))  # defer normalization to O(S*dh)
    # Single lane-dense (S, heads*dh) store; block maps straight into (B, S, H).
    o_ref[0] = outs[0] if heads == 1 else jnp.concatenate(outs, axis=-1)


def _dense_res_ln_kernel(x_ref, res_ref, w_ref, b_ref, g_ref, beta_ref, o_ref, *, eps):
    # LayoutLMSelfOutput: LN(x @ W_o + b_o + residual)
    h = jnp.dot(x_ref[...], w_ref[...], preferred_element_type=jnp.float32)
    h = h + b_ref[...] + res_ref[...].astype(jnp.float32)
    o_ref[...] = _layer_norm(h, g_ref[...], beta_ref[...], eps).astype(o_ref.dtype)


def _ffn_kernel(x_ref, w1_ref, b1_ref, w2_ref, b2_ref, g_ref, beta_ref, o_ref, *, eps):
    # LayoutLMIntermediate + LayoutLMOutput fused: LN(gelu(x@W1+b1)@W2+b2 + x)
    x = x_ref[...]                                              # bf16
    h = jnp.dot(x, w1_ref[...], preferred_element_type=jnp.float32) + b1_ref[...]
    h = _gelu_tanh(h)                                           # f32
    y = jnp.dot(h.astype(jnp.bfloat16), w2_ref[...],
                preferred_element_type=jnp.float32) + b2_ref[...]
    y = y + x.astype(jnp.float32)
    o_ref[...] = _layer_norm(y, g_ref[...], beta_ref[...], eps).astype(o_ref.dtype)


# ---------------------------------------------------------------------------
# pallas_call wrappers
# ---------------------------------------------------------------------------

def _pad_rows(x, n_pad):
    n = x.shape[0]
    return x if n_pad == n else jnp.pad(x, ((0, n_pad - n), (0, 0)))


def _linear(x, w, b, tile_n, n_pad):
    N, K = x.shape
    M = w.shape[1]
    xp = _pad_rows(x, n_pad)
    out = pl.pallas_call(
        _linear_kernel,
        out_shape=jax.ShapeDtypeStruct((n_pad, M), jnp.bfloat16),
        grid_spec=pltpu.PrefetchScalarGridSpec(
            num_scalar_prefetch=0,
            grid=(n_pad // tile_n,),
            in_specs=[
                pl.BlockSpec((tile_n, K), lambda i: (i, 0)),
                pl.BlockSpec((K, M), lambda i: (0, 0)),
                pl.BlockSpec((1, M), lambda i: (0, 0)),
            ],
            out_specs=pl.BlockSpec((tile_n, M), lambda i: (i, 0)),
        ),
        compiler_params=pltpu.CompilerParams(
            dimension_semantics=("parallel",), vmem_limit_bytes=_VMEM_LIMIT),
        cost_estimate=pl.CostEstimate(
            flops=int(2 * n_pad * K * M), transcendentals=0,
            bytes_accessed=int(2 * (n_pad * K + K * M + n_pad * M) + 4 * M)),
    )(xp, w, b.reshape(1, M))
    return out if n_pad == N else out[:N]


def _attention(qkv, mask, *, num_heads, dh, hps, scale):
    # qkv: (B, S, 3H) bf16 with layout [q_heads | k_heads | v_heads].
    B, S, H3 = qkv.shape
    H = H3 // 3
    n_groups = num_heads // hps
    blk = hps * dh
    kern = functools.partial(_attention_kernel, dh=dh, heads=hps, scale=scale)
    return pl.pallas_call(
        kern,
        out_shape=jax.ShapeDtypeStruct((B, S, H), jnp.bfloat16),
        grid_spec=pltpu.PrefetchScalarGridSpec(
            num_scalar_prefetch=0,
            grid=(B, n_groups),
            in_specs=[
                pl.BlockSpec((1, S, blk), lambda b, g: (b, 0, g)),                  # q
                pl.BlockSpec((1, S, blk), lambda b, g: (b, 0, n_groups + g)),       # k
                pl.BlockSpec((1, S, blk), lambda b, g: (b, 0, 2 * n_groups + g)),   # v
                pl.BlockSpec((1, 1, S), lambda b, g: (b, 0, 0)),                    # mask
            ],
            out_specs=pl.BlockSpec((1, S, blk), lambda b, g: (b, 0, g)),
        ),
        compiler_params=pltpu.CompilerParams(
            dimension_semantics=("parallel", "parallel"),
            vmem_limit_bytes=_VMEM_LIMIT),
        cost_estimate=pl.CostEstimate(
            flops=int(4 * B * num_heads * S * S * dh),
            transcendentals=int(B * num_heads * S * S),
            bytes_accessed=int(2 * (3 * B * S * H + B * S * H) + 4 * B * S)),
    )(qkv, qkv, qkv, mask)


def _dense_residual_ln(x, res, w, b, g, beta, eps, tile_n, n_pad):
    N, K = x.shape
    M = w.shape[1]
    kern = functools.partial(_dense_res_ln_kernel, eps=eps)
    out = pl.pallas_call(
        kern,
        out_shape=jax.ShapeDtypeStruct((n_pad, M), jnp.bfloat16),
        grid_spec=pltpu.PrefetchScalarGridSpec(
            num_scalar_prefetch=0,
            grid=(n_pad // tile_n,),
            in_specs=[
                pl.BlockSpec((tile_n, K), lambda i: (i, 0)),
                pl.BlockSpec((tile_n, M), lambda i: (i, 0)),
                pl.BlockSpec((K, M), lambda i: (0, 0)),
                pl.BlockSpec((1, M), lambda i: (0, 0)),
                pl.BlockSpec((1, M), lambda i: (0, 0)),
                pl.BlockSpec((1, M), lambda i: (0, 0)),
            ],
            out_specs=pl.BlockSpec((tile_n, M), lambda i: (i, 0)),
        ),
        compiler_params=pltpu.CompilerParams(
            dimension_semantics=("parallel",), vmem_limit_bytes=_VMEM_LIMIT),
        cost_estimate=pl.CostEstimate(
            flops=int(2 * n_pad * K * M), transcendentals=0,
            bytes_accessed=int(2 * (2 * n_pad * K + K * M + n_pad * M) + 12 * M)),
    )(_pad_rows(x, n_pad), _pad_rows(res, n_pad), w,
      b.reshape(1, M), g.reshape(1, M), beta.reshape(1, M))
    return out if n_pad == N else out[:N]


def _ffn(x, w1, b1, w2, b2, g, beta, eps, tile_n, n_pad):
    N, H = x.shape
    F = w1.shape[1]
    kern = functools.partial(_ffn_kernel, eps=eps)
    out = pl.pallas_call(
        kern,
        out_shape=jax.ShapeDtypeStruct((n_pad, H), jnp.bfloat16),
        grid_spec=pltpu.PrefetchScalarGridSpec(
            num_scalar_prefetch=0,
            grid=(n_pad // tile_n,),
            in_specs=[
                pl.BlockSpec((tile_n, H), lambda i: (i, 0)),
                pl.BlockSpec((H, F), lambda i: (0, 0)),
                pl.BlockSpec((1, F), lambda i: (0, 0)),
                pl.BlockSpec((F, H), lambda i: (0, 0)),
                pl.BlockSpec((1, H), lambda i: (0, 0)),
                pl.BlockSpec((1, H), lambda i: (0, 0)),
                pl.BlockSpec((1, H), lambda i: (0, 0)),
            ],
            out_specs=pl.BlockSpec((tile_n, H), lambda i: (i, 0)),
        ),
        compiler_params=pltpu.CompilerParams(
            dimension_semantics=("parallel",), vmem_limit_bytes=_VMEM_LIMIT),
        cost_estimate=pl.CostEstimate(
            flops=int(4 * n_pad * H * F), transcendentals=int(n_pad * F),
            bytes_accessed=int(2 * (2 * n_pad * H + 2 * H * F) + 4 * (F + 3 * H))),
    )(_pad_rows(x, n_pad), w1, b1.reshape(1, F), w2, b2.reshape(1, H),
      g.reshape(1, H), beta.reshape(1, H))
    return out if n_pad == N else out[:N]


# ---------------------------------------------------------------------------
# Encoder wrapper (LayoutLMEncoder.forward, eval mode, last_hidden_state only)
# ---------------------------------------------------------------------------

def _heads_per_step(num_heads, dh):
    # Lane-dense attention output: process enough heads per step to make the
    # last block dim a multiple of 128 (e.g. 2 heads for dh=64).
    if dh % 128 == 0:
        return 1
    if 128 % dh == 0 and num_heads % (128 // dh) == 0:
        return 128 // dh
    # TODO(synk): odd head_dim / head count falls back to 1 head per step
    # (lane-underdense stores); not hit by standard LayoutLM configs.
    return 1


def _layer_forward(x, mask, p, *, B, S, H, num_heads, dh, hps, eps, tile_n, n_pad):
    # Fused QKV projection (one MXU matmul instead of three), bf16 weights.
    qkv = _linear(x, p["w_qkv"].astype(jnp.bfloat16), p["b_qkv"], tile_n, n_pad)  # (N,3H)
    qkv = qkv.reshape(B, S, 3 * H)                                   # free reshape
    attn = _attention(qkv, mask, num_heads=num_heads, dh=dh, hps=hps,
                      scale=dh ** -0.5)                              # (B,S,H) bf16
    attn = attn.reshape(B * S, H)                                    # free reshape

    # Self-output dense + residual + LayerNorm (fused).
    x = _dense_residual_ln(attn, x, p["w_o"].astype(jnp.bfloat16), p["b_o"],
                           p["ln1_g"], p["ln1_b"], eps, tile_n, n_pad)
    # Intermediate + output dense + residual + LayerNorm (fused FFN).
    x = _ffn(x, p["w_i"].astype(jnp.bfloat16), p["b_i"],
             p["w_o2"].astype(jnp.bfloat16), p["b_o2"],
             p["ln2_g"], p["ln2_b"], eps, tile_n, n_pad)
    return x


def layoutlm_encoder(hidden_states, attention_mask, layer_params, *,
                     num_heads, eps=1e-12, tile_n=None):
    """attention_mask is the additive mask (B, S): 0 = attend, large negative = masked."""
    B, S, H = hidden_states.shape
    N = B * S
    dh = H // num_heads
    if tile_n is None:
        # bf16 operands: 256 keeps the fused FFN comfortably inside VMEM on
        # v5e/v6e and v7x (64 MiB).  (Generation-aware tuning could raise this.)
        tile_n = min(256, _round_up(N, 16))
    assert tile_n % 8 == 0
    n_pad = _round_up(N, tile_n)
    hps = _heads_per_step(num_heads, dh)

    x = hidden_states.reshape(N, H).astype(jnp.bfloat16)
    if attention_mask is None:
        mask = jnp.zeros((B, 1, S), jnp.float32)
    else:
        mask = attention_mask.reshape(B, 1, S).astype(jnp.float32)
    for p in layer_params:
        x = _layer_forward(x, mask, p, B=B, S=S, H=H, num_heads=num_heads,
                           dh=dh, hps=hps, eps=eps, tile_n=tile_n, n_pad=n_pad)
    return x.reshape(B, S, H).astype(hidden_states.dtype)


# ---------------------------------------------------------------------------
# Plain-JAX f32 reference (mirrors the PyTorch forward, eval mode)
# ---------------------------------------------------------------------------

def _reference_encoder(hidden_states, attention_mask, layer_params, num_heads, eps):
    hp = lax.Precision.HIGHEST
    B, S, H = hidden_states.shape
    dh = H // num_heads
    x = hidden_states.astype(jnp.float32)
    mask = attention_mask[:, None, None, :].astype(jnp.float32)
    for p in layer_params:
        qkv = jnp.dot(x, p["w_qkv"], precision=hp) + p["b_qkv"]
        q, k, v = jnp.split(qkv, 3, axis=-1)

        def to_heads(t):
            return t.reshape(B, S, num_heads, dh).transpose(0, 2, 1, 3)

        q, k, v = to_heads(q), to_heads(k), to_heads(v)
        s = jnp.einsum("bhqd,bhkd->bhqk", q, k, precision=hp) * (dh ** -0.5) + mask
        pr = jax.nn.softmax(s, axis=-1)
        o = jnp.einsum("bhqk,bhkd->bhqd", pr, v,
                       precision=hp).transpose(0, 2, 1, 3).reshape(B, S, H)
        h = _layer_norm(jnp.dot(o, p["w_o"], precision=hp) + p["b_o"] + x,
                        p["ln1_g"], p["ln1_b"], eps)
        ff = _gelu_tanh(jnp.dot(h, p["w_i"], precision=hp) + p["b_i"])
        x = _layer_norm(jnp.dot(ff, p["w_o2"], precision=hp) + p["b_o2"] + h,
                        p["ln2_g"], p["ln2_b"], eps)
    return x


if __name__ == "__main__":
    # Small LayoutLM-like config.
    B, S, H = 2, 16, 128
    NUM_HEADS = 2          # head_dim = 64 -> 2 heads per attention grid step
    INTER = 256
    NUM_LAYERS = 2
    EPS = 1e-12
    TILE_N = 16            # forces a >1 grid over the N = B*S = 32 tokens

    key = jax.random.PRNGKey(0)
    keys = jax.random.split(key, 12 * NUM_LAYERS + 2)
    kit = iter(keys)

    def init(shape, scale=0.02):
        return (scale * jax.random.normal(next(kit), shape)).astype(jnp.float32)

    layer_params = []
    for _ in range(NUM_LAYERS):
        layer_params.append({
            "w_qkv": init((H, 3 * H)),     # concat([Wq, Wk, Wv], axis=1)
            "b_qkv": init((3 * H,)),
            "w_o": init((H, H)),
            "b_o": init((H,)),
            "ln1_g": (1.0 + init((H,), 0.1)).astype(jnp.float32),
            "ln1_b": init((H,), 0.1),
            "w_i": init((H, INTER)),
            "b_i": init((INTER,)),
            "w_o2": init((INTER, H)),
            "b_o2": init((H,)),
            "ln2_g": (1.0 + init((H,), 0.1)).astype(jnp.float32),
            "ln2_b": init((H,), 0.1),
        })

    hidden_states = jax.random.normal(next(kit), (B, S, H), dtype=jnp.float32)

    # Additive attention mask: batch 0 fully valid, batch 1 has padded positions.
    lengths = jnp.array([S, 10], dtype=jnp.int32)
    valid = jnp.arange(S, dtype=jnp.int32)[None, :] < lengths[:, None]
    attention_mask = jnp.where(valid, 0.0, -1e9).astype(jnp.float32)

    encoder = jax.jit(functools.partial(
        layoutlm_encoder, num_heads=NUM_HEADS, eps=EPS, tile_n=TILE_N))
    out = jax.block_until_ready(encoder(hidden_states, attention_mask, layer_params))

    ref = _reference_encoder(hidden_states, attention_mask, layer_params, NUM_HEADS, EPS)
    assert out.shape == (B, S, H)
    err = float(jnp.max(jnp.abs(out - ref)))
    # bf16 matmul path vs f32 reference -> tolerance loosened accordingly.
    assert err < 5e-2, f"mismatch vs reference, max abs err = {err}"

    print("KERNEL_OK")
</pallas_src>

<mosaic_0001>
module attributes {stable_mosaic.version = 11 : i64} {
  func.func @_linear_kernel(%arg0: i32, %arg1: memref<16x128xbf16, #tpu.memory_space<vmem>>, %arg2: memref<128x384xbf16, #tpu.memory_space<vmem>>, %arg3: memref<1x384xf32, #tpu.memory_space<vmem>>, %arg4: memref<16x384xbf16, #tpu.memory_space<vmem>>) attributes {dimension_semantics = [#tpu.dimension_semantics<parallel>], iteration_bounds = array<i64: 2>, scalar_prefetch = 0 : i64, scratch_operands = 0 : i64, tpu.core_type = #tpu.core_type<tc>, window_params = [{transform_indices = @transform_0, window_bounds = array<i64: 16, 128>}, {pipeline_mode = #tpu.pipeline_mode<synchronous>, transform_indices = @transform_1, window_bounds = array<i64: 128, 384>}, {pipeline_mode = #tpu.pipeline_mode<synchronous>, transform_indices = @transform_2, window_bounds = array<i64: 1, 384>}, {transform_indices = @transform_3, window_bounds = array<i64: 16, 384>}]} {
    %c0 = arith.constant 0 : index
    %c0_0 = arith.constant 0 : index
    %0 = vector.load %arg1[%c0, %c0_0] : memref<16x128xbf16, #tpu.memory_space<vmem>>, vector<16x128xbf16>
    %c0_1 = arith.constant 0 : index
    %c0_2 = arith.constant 0 : index
    %1 = vector.load %arg2[%c0_1, %c0_2] : memref<128x384xbf16, #tpu.memory_space<vmem>>, vector<128x384xbf16>
    %cst = arith.constant dense<0.000000e+00> : vector<16x384xf32>
    %2 = tpu.matmul %0, %1, %cst {dimension_numbers = #tpu.dot_dimension_numbers<[1], [0], [0], [1], [0, 0, 1, 1], [], []>} : vector<16x128xbf16>, vector<128x384xbf16>, vector<16x384xf32> -> vector<16x384xf32>
    %c0_3 = arith.constant 0 : index
    %c0_4 = arith.constant 0 : index
    %3 = vector.load %arg3[%c0_3, %c0_4] : memref<1x384xf32, #tpu.memory_space<vmem>>, vector<1x384xf32>
    %4 = vector.broadcast %3 : vector<1x384xf32> to vector<16x384xf32>
    %5 = arith.addf %2, %4 : vector<16x384xf32>
    %6 = arith.truncf %5 : vector<16x384xf32> to vector<16x384xbf16>
    %c0_5 = arith.constant 0 : index
    %c0_6 = arith.constant 0 : index
    %7 = vector.load %arg4[%c0_5, %c0_6] : memref<16x384xbf16, #tpu.memory_space<vmem>>, vector<16x384xbf16>
    tpu.vector_store %arg4[%c0_5, %c0_6], %6 {strides = array<i32>} : memref<16x384xbf16, #tpu.memory_space<vmem>>, vector<16x384xbf16>,
    return
  }
  func.func @transform_0(%arg0: i32) -> (i32, i32) {
    %c0_i32 = arith.constant 0 : i32
    %c0_i32_0 = arith.constant 0 : i32
    return %arg0, %c0_i32 : i32, i32
  }
  func.func @transform_1(%arg0: i32) -> (i32, i32) {
    %c0_i32 = arith.constant 0 : i32
    %c0_i32_0 = arith.constant 0 : i32
    %c0_i32_1 = arith.constant 0 : i32
    return %c0_i32, %c0_i32_0 : i32, i32
  }
  func.func @transform_2(%arg0: i32) -> (i32, i32) {
    %c0_i32 = arith.constant 0 : i32
    %c0_i32_0 = arith.constant 0 : i32
    %c0_i32_1 = arith.constant 0 : i32
    return %c0_i32, %c0_i32_0 : i32, i32
  }
  func.func @transform_3(%arg0: i32) -> (i32, i32) {
    %c0_i32 = arith.constant 0 : i32
    %c0_i32_0 = arith.constant 0 : i32
    return %arg0, %c0_i32 : i32, i32
  }
}

module attributes {stable_mosaic.version = 11 : i64} {
  func.func @_dense_res_ln_kernel(%arg0: i32, %arg1: memref<16x128xbf16, #tpu.memory_space<vmem>>, %arg2: memref<16x128xbf16, #tpu.memory_space<vmem>>, %arg3: memref<128x128xbf16, #tpu.memory_space<vmem>>, %arg4: memref<1x128xf32, #tpu.memory_space<vmem>>, %arg5: memref<1x128xf32, #tpu.memory_space<vmem>>, %arg6: memref<1x128xf32, #tpu.memory_space<vmem>>, %arg7: memref<16x128xbf16, #tpu.memory_space<vmem>>) attributes {dimension_semantics = [#tpu.dimension_semantics<parallel>], iteration_bounds = array<i64: 2>, scalar_prefetch = 0 : i64, scratch_operands = 0 : i64, tpu.core_type = #tpu.core_type<tc>, window_params = [{transform_indices = @transform_0, window_bounds = array<i64: 16, 128>}, {transform_indices = @transform_1, window_bounds = array<i64: 16, 128>}, {pipeline_mode = #tpu.pipeline_mode<synchronous>, transform_indices = @transform_2, window_bounds = array<i64: 128, 128>}, {pipeline_mode = #tpu.pipeline_mode<synchronous>, transform_indices = @transform_3, window_bounds = array<i64: 1, 128>}, {pipeline_mode = #tpu.pipeline_mode<synchronous>, transform_indices = @transform_4, window_bounds = array<i64: 1, 128>}, {pipeline_mode = #tpu.pipeline_mode<synchronous>, transform_indices = @transform_5, window_bounds = array<i64: 1, 128>}, {transform_indices = @transform_6, window_bounds = array<i64: 16, 128>}]} {
    %c0 = arith.constant 0 : index
    %c0_0 = arith.constant 0 : index
    %0 = vector.load %arg1[%c0, %c0_0] : memref<16x128xbf16, #tpu.memory_space<vmem>>, vector<16x128xbf16>
    %c0_1 = arith.constant 0 : index
    %c0_2 = arith.constant 0 : index
    %1 = vector.load %arg3[%c0_1, %c0_2] : memref<128x128xbf16, #tpu.memory_space<vmem>>, vector<128x128xbf16>
    %cst = arith.constant dense<0.000000e+00> : vector<16x128xf32>
    %2 = tpu.matmul %0, %1, %cst {dimension_numbers = #tpu.dot_dimension_numbers<[1], [0], [0], [1], [0, 0, 1, 1], [], []>} : vector<16x128xbf16>, vector<128x128xbf16>, vector<16x128xf32> -> vector<16x128xf32>
    %c0_3 = arith.constant 0 : index
    %c0_4 = arith.constant 0 : index
    %3 = vector.load %arg4[%c0_3, %c0_4] : memref<1x128xf32, #tpu.memory_space<vmem>>, vector<1x128xf32>
    %4 = vector.broadcast %3 : vector<1x128xf32> to vector<16x128xf32>
    %5 = arith.addf %2, %4 : vector<16x128xf32>
    %c0_5 = arith.constant 0 : index
    %c0_6 = arith.constant 0 : index
    %6 = vector.load %arg2[%c0_5, %c0_6] : memref<16x128xbf16, #tpu.memory_space<vmem>>, vector<16x128xbf16>
    %7 = arith.extf %6 : vector<16x128xbf16> to vector<16x128xf32>
    %8 = arith.addf %5, %7 : vector<16x128xf32>
    %c0_7 = arith.constant 0 : index
    %c0_8 = arith.constant 0 : index
    %9 = vector.load %arg5[%c0_7, %c0_8] : memref<1x128xf32, #tpu.memory_space<vmem>>, vector<1x128xf32>
    %c0_9 = arith.constant 0 : index
    %c0_10 = arith.constant 0 : index
    %10 = vector.load %arg6[%c0_9, %c0_10] : memref<1x128xf32, #tpu.memory_space<vmem>>, vector<1x128xf32>
    %cst_11 = arith.constant dense<0.000000e+00> : vector<16xf32>
    %11 = vector.multi_reduction <add>, %8, %cst_11 [1] : vector<16x128xf32> to vector<16xf32>
    %12 = vector.shape_cast %11 : vector<16xf32> to vector<16x1xf32>
    %cst_12 = arith.constant 1.280000e+02 : f32
    %13 = vector.broadcast %cst_12 : f32 to vector<16x1xf32>
    %14 = arith.divf %12, %13 : vector<16x1xf32>
    %15 = vector.broadcast %14 : vector<16x1xf32> to vector<16x128xf32>
    %16 = arith.subf %8, %15 : vector<16x128xf32>
    %17 = arith.mulf %16, %16 : vector<16x128xf32>
    %cst_13 = arith.constant dense<0.000000e+00> : vector<16xf32>
    %18 = vector.multi_reduction <add>, %17, %cst_13 [1] : vector<16x128xf32> to vector<16xf32>
    %19 = vector.shape_cast %18 : vector<16xf32> to vector<16x1xf32>
    %cst_14 = arith.constant 1.280000e+02 : f32
    %20 = vector.broadcast %cst_14 : f32 to vector<16x1xf32>
    %21 = arith.divf %19, %20 : vector<16x1xf32>
    %cst_15 = arith.constant 9.99999996E-13 : f32
    %22 = vector.broadcast %cst_15 : f32 to vector<16x1xf32>
    %23 = arith.addf %21, %22 : vector<16x1xf32>
    %24 = math.rsqrt %23 : vector<16x1xf32>
    %25 = vector.broadcast %24 : vector<16x1xf32> to vector<16x128xf32>
    %26 = arith.mulf %16, %25 : vector<16x128xf32>
    %27 = vector.broadcast %9 : vector<1x128xf32> to vector<16x128xf32>
    %28 = arith.mulf %26, %27 : vector<16x128xf32>
    %29 = vector.broadcast %10 : vector<1x128xf32> to vector<16x128xf32>
    %30 = arith.addf %28, %29 : vector<16x128xf32>
    %31 = arith.truncf %30 : vector<16x128xf32> to vector<16x128xbf16>
    %c0_16 = arith.constant 0 : index
    %c0_17 = arith.constant 0 : index
    %32 = vector.load %arg7[%c0_16, %c0_17] : memref<16x128xbf16, #tpu.memory_space<vmem>>, vector<16x128xbf16>
    tpu.vector_store %arg7[%c0_16, %c0_17], %31 {strides = array<i32>} : memref<16x128xbf16, #tpu.memory_space<vmem>>, vector<16x128xbf16>,
    return
  }
  func.func @transform_0(%arg0: i32) -> (i32, i32) {
    %c0_i32 = arith.constant 0 : i32
    %c0_i32_0 = arith.constant 0 : i32
    return %arg0, %c0_i32 : i32, i32
  }
  func.func @transform_1(%arg0: i32) -> (i32, i32) {
    %c0_i32 = arith.constant 0 : i32
    %c0_i32_0 = arith.constant 0 : i32
    return %arg0, %c0_i32 : i32, i32
  }
  func.func @transform_2(%arg0: i32) -> (i32, i32) {
    %c0_i32 = arith.constant 0 : i32
    %c0_i32_0 = arith.constant 0 : i32
    %c0_i32_1 = arith.constant 0 : i32
    return %c0_i32, %c0_i32_0 : i32, i32
  }
  func.func @transform_3(%arg0: i32) -> (i32, i32) {
    %c0_i32 = arith.constant 0 : i32
    %c0_i32_0 = arith.constant 0 : i32
    %c0_i32_1 = arith.constant 0 : i32
    return %c0_i32, %c0_i32_0 : i32, i32
  }
  func.func @transform_4(%arg0: i32) -> (i32, i32) {
    %c0_i32 = arith.constant 0 : i32
    %c0_i32_0 = arith.constant 0 : i32
    %c0_i32_1 = arith.constant 0 : i32
    return %c0_i32, %c0_i32_0 : i32, i32
  }
  func.func @transform_5(%arg0: i32) -> (i32, i32) {
    %c0_i32 = arith.constant 0 : i32
    %c0_i32_0 = arith.constant 0 : i32
    %c0_i32_1 = arith.constant 0 : i32
    return %c0_i32, %c0_i32_0 : i32, i32
  }
  func.func @transform_6(%arg0: i32) -> (i32, i32) {
    %c0_i32 = arith.constant 0 : i32
    %c0_i32_0 = arith.constant 0 : i32
    return %arg0, %c0_i32 : i32, i32
  }
}

module attributes {stable_mosaic.version = 11 : i64} {
  func.func @_attention_kernel(%arg0: i32, %arg1: i32, %arg2: memref<1x16x128xbf16, #tpu.memory_space<vmem>>, %arg3: memref<1x16x128xbf16, #tpu.memory_space<vmem>>, %arg4: memref<1x16x128xbf16, #tpu.memory_space<vmem>>, %arg5: memref<1x1x16xf32, #tpu.memory_space<vmem>>, %arg6: memref<1x16x128xbf16, #tpu.memory_space<vmem>>) attributes {dimension_semantics = [#tpu.dimension_semantics<parallel>, #tpu.dimension_semantics<parallel>], iteration_bounds = array<i64: 2, 1>, scalar_prefetch = 0 : i64, scratch_operands = 0 : i64, tpu.core_type = #tpu.core_type<tc>, window_params = [{transform_indices = @transform_0, window_bounds = array<i64: 1, 16, 128>}, {transform_indices = @transform_1, window_bounds = array<i64: 1, 16, 128>}, {transform_indices = @transform_2, window_bounds = array<i64: 1, 16, 128>}, {transform_indices = @transform_3, window_bounds = array<i64: 1, 1, 16>}, {transform_indices = @transform_4, window_bounds = array<i64: 1, 16, 128>}]} {
    %c0 = arith.constant 0 : index
    %c0_0 = arith.constant 0 : index
    %c0_1 = arith.constant 0 : index
    %0 = vector.load %arg5[%c0, %c0_0, %c0_1] : memref<1x1x16xf32, #tpu.memory_space<vmem>>, vector<1x1x16xf32>
    %1 = vector.shape_cast %0 : vector<1x1x16xf32> to vector<1x16xf32>
    %c0_2 = arith.constant 0 : index
    %c0_3 = arith.constant 0 : index
    %c0_4 = arith.constant 0 : index
    %2 = vector.load %arg2[%c0_2, %c0_3, %c0_4] : memref<1x16x128xbf16, #tpu.memory_space<vmem>>, vector<1x16x128xbf16>
    %3 = vector.shape_cast %2 : vector<1x16x128xbf16> to vector<16x128xbf16>
    %c0_5 = arith.constant 0 : index
    %c0_6 = arith.constant 0 : index
    %c0_7 = arith.constant 0 : index
    %4 = vector.load %arg3[%c0_5, %c0_6, %c0_7] : memref<1x16x128xbf16, #tpu.memory_space<vmem>>, vector<1x16x128xbf16>
    %5 = vector.shape_cast %4 : vector<1x16x128xbf16> to vector<16x128xbf16>
    %c0_8 = arith.constant 0 : index
    %c0_9 = arith.constant 0 : index
    %c0_10 = arith.constant 0 : index
    %6 = vector.load %arg4[%c0_8, %c0_9, %c0_10] : memref<1x16x128xbf16, #tpu.memory_space<vmem>>, vector<1x16x128xbf16>
    %7 = vector.shape_cast %6 : vector<1x16x128xbf16> to vector<16x128xbf16>
    %8 = vector.extract_strided_slice %3 {offsets = [0, 0], sizes = [16, 64], strides = [1, 1]} : vector<16x128xbf16> to vector<16x64xbf16>
    %cst = arith.constant 1.250000e-01 : bf16
    %9 = vector.broadcast %cst : bf16 to vector<16x64xbf16>
    %10 = arith.mulf %8, %9 : vector<16x64xbf16>
    %11 = vector.extract_strided_slice %5 {offsets = [0, 0], sizes = [16, 64], strides = [1, 1]} : vector<16x128xbf16> to vector<16x64xbf16>
    %12 = vector.extract_strided_slice %7 {offsets = [0, 0], sizes = [16, 64], strides = [1, 1]} : vector<16x128xbf16> to vector<16x64xbf16>
    %cst_11 = arith.constant dense<0.000000e+00> : vector<16x16xf32>
    %13 = tpu.matmul %10, %11, %cst_11 {dimension_numbers = #tpu.dot_dimension_numbers<[1], [1], [0], [0], [0, 0, 1, 0], [], []>} : vector<16x64xbf16>, vector<16x64xbf16>, vector<16x16xf32> -> vector<16x16xf32>
    %14 = vector.broadcast %1 : vector<1x16xf32> to vector<16x16xf32>
    %15 = arith.addf %13, %14 : vector<16x16xf32>
    %cst_12 = arith.constant dense<0xFF800000> : vector<16xf32>
    %16 = vector.multi_reduction <maximumf>, %15, %cst_12 [1] : vector<16x16xf32> to vector<16xf32>
    %17 = vector.shape_cast %16 : vector<16xf32> to vector<16x1xf32>
    %18 = vector.broadcast %17 : vector<16x1xf32> to vector<16x16xf32>
    %19 = arith.subf %15, %18 : vector<16x16xf32>
    %20 = math.exp %19 : vector<16x16xf32>
    %cst_13 = arith.constant dense<0.000000e+00> : vector<16xf32>
    %21 = vector.multi_reduction <add>, %20, %cst_13 [1] : vector<16x16xf32> to vector<16xf32>
    %22 = vector.shape_cast %21 : vector<16xf32> to vector<16x1xf32>
    %23 = tpu.reciprocal %22 {approx = true} : vector<16x1xf32> -> vector<16x1xf32>
    %24 = arith.truncf %20 : vector<16x16xf32> to vector<16x16xbf16>
    %cst_14 = arith.constant dense<0.000000e+00> : vector<16x64xf32>
    %25 = tpu.matmul %24, %12, %cst_14 {dimension_numbers = #tpu.dot_dimension_numbers<[1], [0], [0], [1], [0, 0, 1, 1], [], []>} : vector<16x16xbf16>, vector<16x64xbf16>, vector<16x64xf32> -> vector<16x64xf32>
    %26 = vector.broadcast %23 : vector<16x1xf32> to vector<16x64xf32>
    %27 = arith.mulf %25, %26 : vector<16x64xf32>
    %28 = arith.truncf %27 : vector<16x64xf32> to vector<16x64xbf16>
    %29 = vector.extract_strided_slice %3 {offsets = [0, 64], sizes = [16, 64], strides = [1, 1]} : vector<16x128xbf16> to vector<16x64xbf16>
    %cst_15 = arith.constant 1.250000e-01 : bf16
    %30 = vector.broadcast %cst_15 : bf16 to vector<16x64xbf16>
    %31 = arith.mulf %29, %30 : vector<16x64xbf16>
    %32 = vector.extract_strided_slice %5 {offsets = [0, 64], sizes = [16, 64], strides = [1, 1]} : vector<16x128xbf16> to vector<16x64xbf16>
    %33 = vector.extract_strided_slice %7 {offsets = [0, 64], sizes = [16, 64], strides = [1, 1]} : vector<16x128xbf16> to vector<16x64xbf16>
    %cst_16 = arith.constant dense<0.000000e+00> : vector<16x16xf32>
    %34 = tpu.matmul %31, %32, %cst_16 {dimension_numbers = #tpu.dot_dimension_numbers<[1], [1], [0], [0], [0, 0, 1, 0], [], []>} : vector<16x64xbf16>, vector<16x64xbf16>, vector<16x16xf32> -> vector<16x16xf32>
    %35 = vector.broadcast %1 : vector<1x16xf32> to vector<16x16xf32>
    %36 = arith.addf %34, %35 : vector<16x16xf32>
    %cst_17 = arith.constant dense<0xFF800000> : vector<16xf32>
    %37 = vector.multi_reduction <maximumf>, %36, %cst_17 [1] : vector<16x16xf32> to vector<16xf32>
    %38 = vector.shape_cast %37 : vector<16xf32> to vector<16x1xf32>
    %39 = vector.broadcast %38 : vector<16x1xf32> to vector<16x16xf32>
    %40 = arith.subf %36, %39 : vector<16x16xf32>
    %41 = math.exp %40 : vector<16x16xf32>
    %cst_18 = arith.constant dense<0.000000e+00> : vector<16xf32>
    %42 = vector.multi_reduction <add>, %41, %cst_18 [1] : vector<16x16xf32> to vector<16xf32>
    %43 = vector.shape_cast %42 : vector<16xf32> to vector<16x1xf32>
    %44 = tpu.reciprocal %43 {approx = true} : vector<16x1xf32> -> vector<16x1xf32>
    %45 = arith.truncf %41 : vector<16x16xf32> to vector<16x16xbf16>
    %cst_19 = arith.constant dense<0.000000e+00> : vector<16x64xf32>
    %46 = tpu.matmul %45, %33, %cst_19 {dimension_numbers = #tpu.dot_dimension_numbers<[1], [0], [0], [1], [0, 0, 1, 1], [], []>} : vector<16x16xbf16>, vector<16x64xbf16>, vector<16x64xf32> -> vector<16x64xf32>
    %47 = vector.broadcast %44 : vector<16x1xf32> to vector<16x64xf32>
    %48 = arith.mulf %46, %47 : vector<16x64xf32>
    %49 = arith.truncf %48 : vector<16x64xf32> to vector<16x64xbf16>
    %50 = tpu.concatenate %28, %49 in 1 : vector<16x64xbf16>, vector<16x64xbf16> -> vector<16x128xbf16>
    %c0_20 = arith.constant 0 : index
    %c0_21 = arith.constant 0 : index
    %c0_22 = arith.constant 0 : index
    %51 = vector.load %arg6[%c0_20, %c0_21, %c0_22] : memref<1x16x128xbf16, #tpu.memory_space<vmem>>, vector<1x16x128xbf16>
    %52 = vector.shape_cast %51 : vector<1x16x128xbf16> to vector<16x128xbf16>
    %53 = vector.shape_cast %50 : vector<16x128xbf16> to vector<1x16x128xbf16>
    tpu.vector_store %arg6[%c0_20, %c0_21, %c0_22], %53 {strides = array<i32>} : memref<1x16x128xbf16, #tpu.memory_space<vmem>>, vector<1x16x128xbf16>,
    return
  }
  func.func @transform_0(%arg0: i32, %arg1: i32) -> (i32, i32, i32) {
    %c0_i32 = arith.constant 0 : i32
    %c0_i32_0 = arith.constant 0 : i32
    return %arg0, %c0_i32, %arg1 : i32, i32, i32
  }
  func.func @transform_1(%arg0: i32, %arg1: i32) -> (i32, i32, i32) {
    %c1_i32 = arith.constant 1 : i32
    %0 = arith.addi %c1_i32, %arg1 : i32
    %c0_i32 = arith.constant 0 : i32
    %c0_i32_0 = arith.constant 0 : i32
    return %arg0, %c0_i32, %0 : i32, i32, i32
  }
  func.func @transform_2(%arg0: i32, %arg1: i32) -> (i32, i32, i32) {
    %c2_i32 = arith.constant 2 : i32
    %0 = arith.addi %c2_i32, %arg1 : i32
    %c0_i32 = arith.constant 0 : i32
    %c0_i32_0 = arith.constant 0 : i32
    return %arg0, %c0_i32, %0 : i32, i32, i32
  }
  func.func @transform_3(%arg0: i32, %arg1: i32) -> (i32, i32, i32) {
    %c0_i32 = arith.constant 0 : i32
    %c0_i32_0 = arith.constant 0 : i32
    %c0_i32_1 = arith.constant 0 : i32
    return %arg0, %c0_i32, %c0_i32_0 : i32, i32, i32
  }
  func.func @transform_4(%arg0: i32, %arg1: i32) -> (i32, i32, i32) {
    %c0_i32 = arith.constant 0 : i32
    %c0_i32_0 = arith.constant 0 : i32
    return %arg0, %c0_i32, %arg1 : i32, i32, i32
  }
}

module attributes {stable_mosaic.version = 11 : i64} {
  func.func @_ffn_kernel(%arg0: i32, %arg1: memref<16x128xbf16, #tpu.memory_space<vmem>>, %arg2: memref<128x256xbf16, #tpu.memory_space<vmem>>, %arg3: memref<1x256xf32, #tpu.memory_space<vmem>>, %arg4: memref<256x128xbf16, #tpu.memory_space<vmem>>, %arg5: memref<1x128xf32, #tpu.memory_space<vmem>>, %arg6: memref<1x128xf32, #tpu.memory_space<vmem>>, %arg7: memref<1x128xf32, #tpu.memory_space<vmem>>, %arg8: memref<16x128xbf16, #tpu.memory_space<vmem>>) attributes {dimension_semantics = [#tpu.dimension_semantics<parallel>], iteration_bounds = array<i64: 2>, scalar_prefetch = 0 : i64, scratch_operands = 0 : i64, tpu.core_type = #tpu.core_type<tc>, window_params = [{transform_indices = @transform_0, window_bounds = array<i64: 16, 128>}, {pipeline_mode = #tpu.pipeline_mode<synchronous>, transform_indices = @transform_1, window_bounds = array<i64: 128, 256>}, {pipeline_mode = #tpu.pipeline_mode<synchronous>, transform_indices = @transform_2, window_bounds = array<i64: 1, 256>}, {pipeline_mode = #tpu.pipeline_mode<synchronous>, transform_indices = @transform_3, window_bounds = array<i64: 256, 128>}, {pipeline_mode = #tpu.pipeline_mode<synchronous>, transform_indices = @transform_4, window_bounds = array<i64: 1, 128>}, {pipeline_mode = #tpu.pipeline_mode<synchronous>, transform_indices = @transform_5, window_bounds = array<i64: 1, 128>}, {pipeline_mode = #tpu.pipeline_mode<synchronous>, transform_indices = @transform_6, window_bounds = array<i64: 1, 128>}, {transform_indices = @transform_7, window_bounds = array<i64: 16, 128>}]} {
    %c0 = arith.constant 0 : index
    %c0_0 = arith.constant 0 : index
    %0 = vector.load %arg1[%c0, %c0_0] : memref<16x128xbf16, #tpu.memory_space<vmem>>, vector<16x128xbf16>
    %c0_1 = arith.constant 0 : index
    %c0_2 = arith.constant 0 : index
    %1 = vector.load %arg2[%c0_1, %c0_2] : memref<128x256xbf16, #tpu.memory_space<vmem>>, vector<128x256xbf16>
    %cst = arith.constant dense<0.000000e+00> : vector<16x256xf32>
    %2 = tpu.matmul %0, %1, %cst {dimension_numbers = #tpu.dot_dimension_numbers<[1], [0], [0], [1], [0, 0, 1, 1], [], []>} : vector<16x128xbf16>, vector<128x256xbf16>, vector<16x256xf32> -> vector<16x256xf32>
    %c0_3 = arith.constant 0 : index
    %c0_4 = arith.constant 0 : index
    %3 = vector.load %arg3[%c0_3, %c0_4] : memref<1x256xf32, #tpu.memory_space<vmem>>, vector<1x256xf32>
    %4 = vector.broadcast %3 : vector<1x256xf32> to vector<16x256xf32>
    %5 = arith.addf %2, %4 : vector<16x256xf32>
    %cst_5 = arith.constant 5.000000e-01 : f32
    %6 = vector.broadcast %cst_5 : f32 to vector<16x256xf32>
    %7 = arith.mulf %6, %5 : vector<16x256xf32>
    %cst_6 = arith.constant 4.471500e-02 : f32
    %8 = vector.broadcast %cst_6 : f32 to vector<16x256xf32>
    %9 = arith.mulf %8, %5 : vector<16x256xf32>
    %10 = arith.mulf %9, %5 : vector<16x256xf32>
    %11 = arith.mulf %10, %5 : vector<16x256xf32>
    %12 = arith.addf %5, %11 : vector<16x256xf32>
    %cst_7 = arith.constant 0.797884583 : f32
    %13 = vector.broadcast %cst_7 : f32 to vector<16x256xf32>
    %14 = arith.mulf %13, %12 : vector<16x256xf32>
    %15 = math.tanh %14 : vector<16x256xf32>
    %cst_8 = arith.constant 1.000000e+00 : f32
    %16 = vector.broadcast %cst_8 : f32 to vector<16x256xf32>
    %17 = arith.addf %16, %15 : vector<16x256xf32>
    %18 = arith.mulf %7, %17 : vector<16x256xf32>
    %19 = arith.truncf %18 : vector<16x256xf32> to vector<16x256xbf16>
    %c0_9 = arith.constant 0 : index
    %c0_10 = arith.constant 0 : index
    %20 = vector.load %arg4[%c0_9, %c0_10] : memref<256x128xbf16, #tpu.memory_space<vmem>>, vector<256x128xbf16>
    %cst_11 = arith.constant dense<0.000000e+00> : vector<16x128xf32>
    %21 = tpu.matmul %19, %20, %cst_11 {dimension_numbers = #tpu.dot_dimension_numbers<[1], [0], [0], [1], [0, 0, 1, 1], [], []>} : vector<16x256xbf16>, vector<256x128xbf16>, vector<16x128xf32> -> vector<16x128xf32>
    %c0_12 = arith.constant 0 : index
    %c0_13 = arith.constant 0 : index
    %22 = vector.load %arg5[%c0_12, %c0_13] : memref<1x128xf32, #tpu.memory_space<vmem>>, vector<1x128xf32>
    %23 = vector.broadcast %22 : vector<1x128xf32> to vector<16x128xf32>
    %24 = arith.addf %21, %23 : vector<16x128xf32>
    %25 = arith.extf %0 : vector<16x128xbf16> to vector<16x128xf32>
    %26 = arith.addf %24, %25 : vector<16x128xf32>
    %c0_14 = arith.constant 0 : index
    %c0_15 = arith.constant 0 : index
    %27 = vector.load %arg6[%c0_14, %c0_15] : memref<1x128xf32, #tpu.memory_space<vmem>>, vector<1x128xf32>
    %c0_16 = arith.constant 0 : index
    %c0_17 = arith.constant 0 : index
    %28 = vector.load %arg7[%c0_16, %c0_17] : memref<1x128xf32, #tpu.memory_space<vmem>>, vector<1x128xf32>
    %cst_18 = arith.constant dense<0.000000e+00> : vector<16xf32>
    %29 = vector.multi_reduction <add>, %26, %cst_18 [1] : vector<16x128xf32> to vector<16xf32>
    %30 = vector.shape_cast %29 : vector<16xf32> to vector<16x1xf32>
    %cst_19 = arith.constant 1.280000e+02 : f32
    %31 = vector.broadcast %cst_19 : f32 to vector<16x1xf32>
    %32 = arith.divf %30, %31 : vector<16x1xf32>
    %33 = vector.broadcast %32 : vector<16x1xf32> to vector<16x128xf32>
    %34 = arith.subf %26, %33 : vector<16x128xf32>
    %35 = arith.mulf %34, %34 : vector<16x128xf32>
    %cst_20 = arith.constant dense<0.000000e+00> : vector<16xf32>
    %36 = vector.multi_reduction <add>, %35, %cst_20 [1] : vector<16x128xf32> to vector<16xf32>
    %37 = vector.shape_cast %36 : vector<16xf32> to vector<16x1xf32>
    %cst_21 = arith.constant 1.280000e+02 : f32
    %38 = vector.broadcast %cst_21 : f32 to vector<16x1xf32>
    %39 = arith.divf %37, %38 : vector<16x1xf32>
    %cst_22 = arith.constant 9.99999996E-13 : f32
    %40 = vector.broadcast %cst_22 : f32 to vector<16x1xf32>
    %41 = arith.addf %39, %40 : vector<16x1xf32>
    %42 = math.rsqrt %41 : vector<16x1xf32>
    %43 = vector.broadcast %42 : vector<16x1xf32> to vector<16x128xf32>
    %44 = arith.mulf %34, %43 : vector<16x128xf32>
    %45 = vector.broadcast %27 : vector<1x128xf32> to vector<16x128xf32>
    %46 = arith.mulf %44, %45 : vector<16x128xf32>
    %47 = vector.broadcast %28 : vector<1x128xf32> to vector<16x128xf32>
    %48 = arith.addf %46, %47 : vector<16x128xf32>
    %49 = arith.truncf %48 : vector<16x128xf32> to vector<16x128xbf16>
    %c0_23 = arith.constant 0 : index
    %c0_24 = arith.constant 0 : index
    %50 = vector.load %arg8[%c0_23, %c0_24] : memref<16x128xbf16, #tpu.memory_space<vmem>>, vector<16x128xbf16>
    tpu.vector_store %arg8[%c0_23, %c0_24], %49 {strides = array<i32>} : memref<16x128xbf16, #tpu.memory_space<vmem>>, vector<16x128xbf16>,
    return
  }
  func.func @transform_0(%arg0: i32) -> (i32, i32) {
    %c0_i32 = arith.constant 0 : i32
    %c0_i32_0 = arith.constant 0 : i32
    return %arg0, %c0_i32 : i32, i32
  }
  func.func @transform_1(%arg0: i32) -> (i32, i32) {
    %c0_i32 = arith.constant 0 : i32
    %c0_i32_0 = arith.constant 0 : i32
    %c0_i32_1 = arith.constant 0 : i32
    return %c0_i32, %c0_i32_0 : i32, i32
  }
  func.func @transform_2(%arg0: i32) -> (i32, i32) {
    %c0_i32 = arith.constant 0 : i32
    %c0_i32_0 = arith.constant 0 : i32
    %c0_i32_1 = arith.constant 0 : i32
    return %c0_i32, %c0_i32_0 : i32, i32
  }
  func.func @transform_3(%arg0: i32) -> (i32, i32) {
    %c0_i32 = arith.constant 0 : i32
    %c0_i32_0 = arith.constant 0 : i32
    %c0_i32_1 = arith.constant 0 : i32
    return %c0_i32, %c0_i32_0 : i32, i32
  }
  func.func @transform_4(%arg0: i32) -> (i32, i32) {
    %c0_i32 = arith.constant 0 : i32
    %c0_i32_0 = arith.constant 0 : i32
    %c0_i32_1 = arith.constant 0 : i32
    return %c0_i32, %c0_i32_0 : i32, i32
  }
  func.func @transform_5(%arg0: i32) -> (i32, i32) {
    %c0_i32 = arith.constant 0 : i32
    %c0_i32_0 = arith.constant 0 : i32
    %c0_i32_1 = arith.constant 0 : i32
    return %c0_i32, %c0_i32_0 : i32, i32
  }
  func.func @transform_6(%arg0: i32) -> (i32, i32) {
    %c0_i32 = arith.constant 0 : i32
    %c0_i32_0 = arith.constant 0 : i32
    %c0_i32_1 = arith.constant 0 : i32
    return %c0_i32, %c0_i32_0 : i32, i32
  }
  func.func @transform_7(%arg0: i32) -> (i32, i32) {
    %c0_i32 = arith.constant 0 : i32
    %c0_i32_0 = arith.constant 0 : i32
    return %arg0, %c0_i32 : i32, i32
  }
}

</mosaic_0001>

<bundles_post_ra>
// kernel: layoutlm_encoder.10
= control target key start
LH: loop header
LB: loop body
LE: loop exit
PB: predicated region body
PF: predicated region fallthrough
CT: control target
= control target key end

     0   :  { %s658_s21 = smov 0   ;;  %s716_s0 = inlined_call_operand.vmem [shape: bf16[32,128], index: 0, kind: input, shape index: {}]   ;;  %s717_s1 = inlined_call_operand.vmem [shape: bf16[32,128], index: 1, kind: input, shape index: {}]   ;;  %s718_s2 = inlined_call_operand.vmem [shape: bf16[128,128], index: 2, kind: input, shape index: {}]   ;;  %s719_s3 = inlined_call_operand.vmem [shape: f32[1,128], index: 3, kind: input, shape index: {}]   ;;  %s720_s4 = inlined_call_operand.vmem [shape: f32[1,128], index: 4, kind: input, shape index: {}]   ;;  %s721_s5 = inlined_call_operand.vmem [shape: f32[1,128], index: 5, kind: input, shape index: {}]   ;;  %s722_s6 = inlined_call_operand.vmem [shape: bf16[32,128], index: 6, kind: output, shape index: {}]  }
   0x1 LB: > { %s523_s22 = sadd.s32 4294967295, %s619_s21   ;;  %p527_p0 = scmp.ge.s32.totalorder %s619_s21, 1  ;;  %s619_s21 = sphi %s658_s21, %s16_s21  }
   0x2   : > { %p224_p1 = scmp.lt.s32.totalorder %s619_s21, 3 }
   0x4   : > { %p225_p2 = pnand %p527_p0, %p224_p1 }
   0x5   : > { %s528_s27 = sshll.u32 (!%p225_p2), %s523_s22, 1 }
   0x6   : > { %228 = sbr.rel (%p225_p2) target bundleno = 554 (0x22a), region = 44  ;;  %p260_p3 = scmp.lt.s32.totalorder (!%p225_p2), %s528_s27, 3 }
   0xb   : > { %v600_v0 = vld [vmem:[%s718_s2 + $0x38] sm:$0xff]   ;;  %v621_v1 = vmov 0.0   ;;  %v601_v2 = vld [vmem:[%s718_s2 + $0x30] sm:$0xff]   ;;  %vm622_vm0 = vmmov 0   ;;  %s724_s27 = smov (!%p260_p3, %s528_s27), 3  ;;  %v602_v3 = vld [vmem:[%s718_s2 + $0x28] sm:$0xff]  }
   0xc   : > { %570 = vmatprep.subr.bf16.mxu0 %v621_v1  ;;  %586 = vmatprep.mubr.msk.bf16.mxu0 %vm622_vm0, %v621_v1  ;;  %s675_s30 = sshll.u32 %s724_s27, 2  ;;  %v603_v4 = vld [vmem:[%s718_s2 + $0x20] sm:$0xff]   ;;  %v604_v5 = vld [vmem:[%s718_s2 + $0x18] sm:$0xff]   ;;  %v605_v6 = vld [vmem:[%s718_s2 + $0x10] sm:$0xff]  }
   0xd   : > { %571 = vmatpush3.bf16.msra.mxu0 %v600_v0  ;;  %s263_s9 = scalar_lea.vmem %s716_s0, %s675_s30  ;;  %v606_v7 = vld [vmem:[%s718_s2 + $0x8] sm:$0xff]   ;;  %v607_v8 = vld [vmem:[%s718_s2] sm:$0xff]   ;;  %s269_s23 = scalar_lea.vmem %s717_s1, %s675_s30 }
   0xe   : > { %572 = vmatprep.subr.bf16.mxu0 %v621_v1  ;;  %v608_v9 = vld [vmem:[%s263_s9] sm:$0xff]   ;;  %s275_s9 = scalar_lea.vmem %s722_s6, %s675_s30 }
   0xf   : > { %v553_v10 = vld [vmem:[%s269_s23] sm:$0xff]  }
  0x10   : > { %v534_v11 = vld [vmem:[%s719_s3] ss:$0 sm:$0xff]  ;;  %v554_v12 = vunpack.c.l.bf16 %v553_v10  ;;  %v555_v17 = vunpack.c.h.bf16 %v553_v10 }
  0x11   : > { %573 = vmatpush3.bf16.msra.mxu0 %v601_v2  ;;  %v544_v38 = vld [vmem:[%s720_s4] ss:$0 sm:$0xff] }
  0x12   : > { %574 = vmatprep.subr.bf16.mxu0 %v621_v1  ;;  %v545_v42 = vld [vmem:[%s721_s5] ss:$0 sm:$0xff] }
  0x15   : > { %575 = vmatpush3.bf16.msra.mxu0 %v602_v3 }
  0x16   : > { %576 = vmatprep.subr.bf16.mxu0 %v621_v1 }
  0x19   : > { %577 = vmatpush3.bf16.msra.mxu0 %v603_v4 }
  0x1a   : > { %578 = vmatprep.subr.bf16.mxu0 %v621_v1 }
  0x1d   : > { %579 = vmatpush3.bf16.msra.mxu0 %v604_v5 }
  0x1e   : > { %580 = vmatprep.subr.bf16.mxu0 %v621_v1 }
  0x21   : > { %581 = vmatpush3.bf16.msra.mxu0 %v605_v6 }
  0x22   : > { %582 = vmatprep.subr.bf16.mxu0 %v621_v1 }
  0x25   : > { %583 = vmatpush3.bf16.msra.mxu0 %v606_v7 }
  0x26   : > { %584 = vmatprep.subr.bf16.mxu0 %v621_v1 }
  0x29   : > { %585 = vmatpush3.bf16.msra.mxu0 %v607_v8 }
  0x2c   : > { %587 = vmatmul.mubr.bf16.vlgmr.msra.gmra.mxu0 %v608_v9 }
  0xec   : > { %v391_v13 = vpop.f32.mrf.mxu0 }
  0xed   : > { %v392_v14 = vadd.f32 %v534_v11, %v391_v13 }
  0xee   : > { %v588_v15 = vpop.f32.mrf.mxu0 }
  0xef   : > { %v402_v16 = vadd.f32 %v554_v12, %v392_v14 }
  0xf0   : > { %v394_v18 = vpop.f32.mrf.mxu0 }
  0xf1   : > { %v395_v19 = vadd.f32 %v534_v11, %v394_v18  ;;  %406 = vadd.xlane.f32.xlu0 %v402_v16 }
  0xf2   : > { %v589_v20 = vpop.f32.mrf.mxu0 }
  0xf3   : > { %v403_v21 = vadd.f32 %v555_v17, %v395_v19 }
  0xf5   : > { %408 = vadd.xlane.f32.xlu0 %v403_v21 }
 0x17a   : > { %v407_v22 = vpop.xlane.xlu0 %406 }
 0x17b   : > { %v411_v23 = vmul.f32 0.0078125, %v407_v22 }
 0x17d   : > { %v413_v24 = vsub.f32 %v402_v16, %v411_v23 }
 0x17e   : > { %v409_v25 = vpop.xlane.xlu0 %408 }
 0x17f   : > { %v412_v26 = vmul.f32 0.0078125, %v409_v25  ;;  %v415_v27 = vmul.f32 %v413_v24, %v413_v24 }
 0x181   : > { %v414_v28 = vsub.f32 %v403_v21, %v412_v26  ;;  %417 = vadd.xlane.f32.xlu1 %v415_v27 }
 0x183   : > { %v416_v29 = vmul.f32 %v414_v28, %v414_v28 }
 0x185   : > { %419 = vadd.xlane.f32.xlu1 %v416_v29 }
 0x20a   : > { %v418_v30 = vpop.xlane.xlu1 %417 }
 0x20b   : > { %v421_v31 = vmul.f32 0.0078125, %v418_v30 }
 0x20d   : > { %v423_v32 = vadd.f32 1e-12, %v421_v31 }
 0x20e   : > { %v420_v33 = vpop.xlane.xlu1 %419 }
 0x20f   : > { %609 = vrsqrt.f32 %v423_v32  ;;  %v422_v34 = vmul.f32 0.0078125, %v420_v33 }
 0x211   : > { %v424_v35 = vadd.f32 1e-12, %v422_v34 }
 0x213   : > { %611 = vrsqrt.f32 %v424_v35 }
 0x21c   : > { %v610_v36 = vpop.eup %609 }
 0x21d   : > { %v427_v37 = vmul.f32 %v610_v36, %v413_v24 }
 0x21f   : > { %v435_v40 = vmul.f32 %v544_v38, %v427_v37 }
 0x220   : > { %v612_v39 = vpop.eup %611 }
 0x221   : > { %v428_v41 = vmul.f32 %v612_v39, %v414_v28  ;;  %v443_v44 = vadd.f32 %v545_v42, %v435_v40 }
 0x223   : > { %v436_v43 = vmul.f32 %v544_v38, %v428_v41 }
 0x225   : > { %v444_v45 = vadd.f32 %v545_v42, %v436_v43 }
 0x227   : > { %v559_v46 = vpack.c.bf16 %v444_v45, %v443_v44 }
 0x229   : > { %560 = vst [vmem:[%s275_s9] sm:$0xff] %v559_v46  }
 0x22a PF: > { %s16_s21 = sadd.s32 1, %s619_s21  }
 0x22b   : > { %p13_p4 = scmp.ge.s32.totalorder %s16_s21, 4  }
 0x22d   :  { %15 = sbr.rel (!%p13_p4) target bundleno = 1 (0x1), region = 77 }

// kernel: layoutlm_encoder.8
= control target key start
LH: loop header
LB: loop body
LE: loop exit
PB: predicated region body
PF: predicated region fallthrough
CT: control target
= control target key end

     0   :  { %s677_s12 = smov 0   ;;  %s773_s0 = inlined_call_operand.vmem [shape: bf16[32,128], index: 0, kind: input, shape index: {}]   ;;  %s774_s1 = inlined_call_operand.vmem [shape: bf16[128,384], index: 1, kind: input, shape index: {}]   ;;  %s775_s2 = inlined_call_operand.vmem [shape: f32[1,384], index: 2, kind: input, shape index: {}]   ;;  %s776_s3 = inlined_call_operand.vmem [shape: bf16[32,384], index: 3, kind: output, shape index: {}]  }
   0x1 LB: > { %s528_s13 = sadd.s32 4294967295, %s652_s12   ;;  %p532_p0 = scmp.ge.s32.totalorder %s652_s12, 1  ;;  %s652_s12 = sphi %s677_s12, %s13_s12  }
   0x2   : > { %p138_p1 = scmp.lt.s32.totalorder %s652_s12, 3 }
   0x4   : > { %p139_p2 = pnand %p532_p0, %p138_p1 }
   0x5   : > { %s533_s20 = sshll.u32 (!%p139_p2), %s528_s13, 1 }
   0x6   : > { %142 = sbr.rel (%p139_p2) target bundleno = 249 (0xf9), region = 32  ;;  %p164_p3 = scmp.lt.s32.totalorder (!%p139_p2), %s533_s20, 3 }
   0xb   : > { %v613_v0 = vld [vmem:[%s774_s1 + $0xac] ss:$12 sps:$4 sm:$0xff]   ;;  %v654_v1 = vmov 0.0   ;;  %v615_v2 = vld [vmem:[%s774_s1 + $0xb0] ss:$12 sps:$4 sm:$0xff]   ;;  %vm655_vm0 = vmmov 0   ;;  %v213_v27 = vlaneseq }
   0xc   : > { %581 = vmatprep.subr.bf16.mxu1 %v654_v1  ;;  %597 = vmatprep.mubr.msk.bf16.mxu1 %vm655_vm0, %v654_v1  ;;  %v616_v3 = vld [vmem:[%s774_s1 + $0xa8] ss:$12 sps:$4 sm:$0xff]   ;;  %v656_v5 = vmov 0   ;;  %v619_v6 = vld [vmem:[%s774_s1 + $0x98] ss:$12 sps:$4 sm:$0xff]   ;;  %s778_s20 = smov (!%p164_p3, %s533_s20), 3 }
   0xd   : > { %362 = vmatprep.subr.bf16.mxu0 %v613_v0  ;;  %582 = vmatpush3.bf16.msra.mxu1 %v615_v2  ;;  %v617_v4 = vld [vmem:[%s774_s1 + $0x94] ss:$12 sps:$4 sm:$0xff]   ;;  %v620_v7 = vld [vmem:[%s774_s1 + $0x90] ss:$12 sps:$4 sm:$0xff]   ;;  %v624_v10 = vld [vmem:[%s774_s1 + $0x78] ss:$12 sps:$4 sm:$0xff]  }
   0xe   : > { %394 = vmatprep.mubr.bf16.mxu0 %v656_v5  ;;  %363 = vmatpush1.bf16.msra.mxu0 %v616_v3  ;;  %v621_v8 = vld [vmem:[%s774_s1 + $0x7c] ss:$12 sps:$4 sm:$0xff]   ;;  %v623_v9 = vld [vmem:[%s774_s1 + $0x80] ss:$12 sps:$4 sm:$0xff]   ;;  %v625_v11 = vld [vmem:[%s774_s1 + $0x64] ss:$12 sps:$4 sm:$0xff]  }
   0xf   : > { %583 = vmatprep.subr.bf16.mxu1 %v654_v1  ;;  %364 = vmatprep.subr.bf16.mxu0 %v617_v4  ;;  %v627_v12 = vld [vmem:[%s774_s1 + $0x68] ss:$12 sps:$4 sm:$0xff]   ;;  %v628_v13 = vld [vmem:[%s774_s1 + $0x60] ss:$12 sps:$4 sm:$0xff]   ;;  %s534_s15 = sshll.u32 %s778_s20, 2  ;;  %v214_v28 = vshrl.u32 %v213_v27, 7 }
  0x10   : > { %v629_v14 = vld [vmem:[%s774_s1 + $0x4c] ss:$12 sps:$4 sm:$0xff]   ;;  %v631_v15 = vld [vmem:[%s774_s1 + $0x50] ss:$12 sps:$4 sm:$0xff]   ;;  %v632_v16 = vld [vmem:[%s774_s1 + $0x48] ss:$12 sps:$4 sm:$0xff]   ;;  %s167_s25 = scalar_lea.vmem %s773_s0, %s534_s15 }
  0x11   : > { %584 = vmatpush3.bf16.msra.mxu1 %v619_v6  ;;  %v633_v17 = vld [vmem:[%s774_s1 + $0x34] ss:$12 sps:$4 sm:$0xff]   ;;  %v635_v18 = vld [vmem:[%s774_s1 + $0x38] ss:$12 sps:$4 sm:$0xff]   ;;  %v636_v19 = vld [vmem:[%s774_s1 + $0x30] ss:$12 sps:$4 sm:$0xff]  }
  0x12   : > { %365 = vmatpush1.bf16.msra.mxu0 %v620_v7  ;;  %585 = vmatprep.subr.bf16.mxu1 %v654_v1  ;;  %v637_v20 = vld [vmem:[%s774_s1 + $0x1c] ss:$12 sps:$4 sm:$0xff]   ;;  %v639_v21 = vld [vmem:[%s774_s1 + $0x20] ss:$12 sps:$4 sm:$0xff]   ;;  %v640_v22 = vld [vmem:[%s774_s1 + $0x18] ss:$12 sps:$4 sm:$0xff]  }
  0x13   : > { %366 = vmatprep.subr.bf16.mxu0 %v621_v8  ;;  %v641_v23 = vld [vmem:[%s774_s1 + $0x4] ss:$12 sps:$4 sm:$0xff]   ;;  %v643_v24 = vld [vmem:[%s774_s1 + $0x8] ss:$12 sps:$4 sm:$0xff]   ;;  %v644_v25 = vld [vmem:[%s774_s1] ss:$12 sps:$4 sm:$0xff]  }
  0x14   : > { %v645_v26 = vld [vmem:[%s167_s25] sm:$0xff]   ;;  %v223_v29 = vsub.s32 2, %v214_v28  ;;  %v215_v31 = vsub.s32 0, %v214_v28  ;;  %v219_v32 = vsub.s32 1, %v214_v28  ;;  %s601_s18 = smul.u32 12, %s778_s20 }
  0x15   : > { %586 = vmatpush3.bf16.msra.mxu1 %v623_v9  ;;  %v211_v30 = vld [vmem:[%s775_s2] sm:$0x7] }
  0x16   : > { %367 = vmatpush1.bf16.msra.mxu0 %v624_v10  ;;  %587 = vmatprep.subr.bf16.mxu1 %v654_v1  ;;  %v224_v33 = vrot.slane %v211_v30, %v223_v29  ;;  %v216_v35 = vrot.slane %v211_v30, %v215_v31  ;;  %v220_v36 = vrot.slane %v211_v30, %v219_v32  ;;  %s174_s22 = scalar_lea.vmem %s776_s3, %s601_s18 }
  0x17   : > { %368 = vmatprep.subr.bf16.mxu0 %v625_v11 }
  0x19   : > { %588 = vmatpush3.bf16.msra.mxu1 %v627_v12 }
  0x1a   : > { %369 = vmatpush1.bf16.msra.mxu0 %v628_v13  ;;  %589 = vmatprep.subr.bf16.mxu1 %v654_v1 }
  0x1b   : > { %370 = vmatprep.subr.bf16.mxu0 %v629_v14 }
  0x1d   : > { %590 = vmatpush3.bf16.msra.mxu1 %v631_v15 }
  0x1e   : > { %371 = vmatpush1.bf16.msra.mxu0 %v632_v16  ;;  %591 = vmatprep.subr.bf16.mxu1 %v654_v1 }
  0x1f   : > { %372 = vmatprep.subr.bf16.mxu0 %v633_v17 }
  0x21   : > { %592 = vmatpush3.bf16.msra.mxu1 %v635_v18 }
  0x22   : > { %373 = vmatpush1.bf16.msra.mxu0 %v636_v19  ;;  %593 = vmatprep.subr.bf16.mxu1 %v654_v1 }
  0x23   : > { %374 = vmatprep.subr.bf16.mxu0 %v637_v20 }
  0x25   : > { %594 = vmatpush3.bf16.msra.mxu1 %v639_v21 }
  0x26   : > { %375 = vmatpush1.bf16.msra.mxu0 %v640_v22  ;;  %595 = vmatprep.subr.bf16.mxu1 %v654_v1 }
  0x27   : > { %376 = vmatprep.subr.bf16.mxu0 %v641_v23 }
  0x29   : > { %596 = vmatpush3.bf16.msra.mxu1 %v643_v24 }
  0x2a   : > { %377 = vmatpush1.bf16.msra.mxu0 %v644_v25 }
  0x2c   : > { %598 = vmatmul.mubr.bf16.vlgmr.msra.gmra.mxu1 %v645_v26 }
  0x2d   : > { %395 = vmatmul.mubr.bf16.vlgmr.msra.gmra.mxu0 %v645_v26 }
  0xec   : > { %v439_v34 = vpop.f32.mrf.mxu1 }
  0xed   : > { %v440_v37 = vadd.f32 %v439_v34, %v224_v33  ;;  %v396_v38 = vpop.f32.mrf.mxu0 }
  0xee   : > { %v599_v39 = vpop.f32.mrf.mxu1  ;;  %v397_v42 = vadd.f32 %v396_v38, %v216_v35 }
  0xef   : > { %v569_v40 = vpack.c.bf16 %v440_v37, %v440_v37  ;;  %v398_v41 = vpop.f32.mrf.mxu0 }
  0xf0   : > { %v399_v43 = vadd.f32 %v398_v41, %v220_v36  ;;  %v442_v44 = vpop.f32.mrf.mxu1 }
  0xf1   : > { %467 = vst [vmem:[%s174_s22 + $0x8] sm:$0xf] %v569_v40  ;;  %v443_v45 = vadd.f32 %v442_v44, %v224_v33  ;;  %v400_v46 = vpop.f32.mrf.mxu0 }
  0xf2   : > { %v568_v47 = vpack.c.bf16 %v399_v43, %v397_v42  ;;  %v600_v48 = vpop.f32.mrf.mxu1  ;;  %v401_v51 = vadd.f32 %v400_v46, %v216_v35 }
  0xf3   : > { %v571_v49 = vpack.c.bf16 %v443_v45, %v443_v45  ;;  %v402_v50 = vpop.f32.mrf.mxu0 }
  0xf4   : > { %466 = vst [vmem:[%s174_s22] sm:$0xff] %v568_v47  ;;  %v403_v52 = vadd.f32 %v402_v50, %v220_v36 }
  0xf5   : > { %469 = vst [vmem:[%s174_s22 + $0x14] sm:$0xf] %v571_v49 }
  0xf6   : > { %v570_v53 = vpack.c.bf16 %v403_v52, %v401_v51 }
  0xf8   : > { %468 = vst [vmem:[%s174_s22 + $0xc] sm:$0xff] %v570_v53 }
  0xf9 PF: > { %s13_s12 = sadd.s32 1, %s652_s12  }
  0xfa   : > { %p10_p4 = scmp.ge.s32.totalorder %s13_s12, 4  }
  0xfc   :  { %12 = sbr.rel (!%p10_p4) target bundleno = 1 (0x1), region = 62 }

// kernel: layoutlm_encoder.9
= control target key start
LH: loop header
LB: loop body
LE: loop exit
PB: predicated region body
PF: predicated region fallthrough
CT: control target
= control target key end

     0   :  { %s1051_s15 = smov 0   ;;  %s1053_s16 = smov 0   ;;  %s1172_s0 = inlined_call_operand.vmem [shape: bf16[2,16,384], index: 0, kind: input, shape index: {}, may-alias: {0,1,2}]   ;;  %s1173_s1 = inlined_call_operand.vmem [shape: bf16[2,16,384], index: 1, kind: input, shape index: {}, may-alias: {0,1,2}]   ;;  %s1174_s2 = inlined_call_operand.vmem [shape: bf16[2,16,384], index: 2, kind: input, shape index: {}, may-alias: {0,1,2}]   ;;  %s1175_s3 = inlined_call_operand.vmem [shape: f32[2,1,16], index: 3, kind: input, shape index: {}]   ;;  %s1176_s4 = inlined_call_operand.vmem [shape: bf16[2,16,128], index: 4, kind: output, shape index: {}]  }
   0x1   :  { %s1055_s17 = smov 0   ;;  %s1057_s18 = smov 0  }
   0x2   :  { %s1059_s19 = smov 0  }
   0x3 LB: > { %s26_s20 = sadd.s32 1, %s1017_s18  ;;  %p42_p1 = scmp.ne.s32.totalorder %s1009_s16, %s1005_s15  ;;  %s1021_s19 = sphi %s1059_s19, %s14_s19   ;;  %s1017_s18 = sphi %s1057_s18, %s1181_s18   ;;  %s1013_s17 = sphi %s1055_s17, %s1180_s17   ;;  %s1009_s16 = sphi %s1053_s16, %s1179_s16   ;;  %s1005_s15 = sphi %s1051_s15, %s1178_s15  }
   0x4   : > { %p28_p0 = scmp.ge.s32.totalorder %s26_s20, 2  ;;  %p43_p2 = scmp.eq.s32.totalorder %s1021_s19, 0 }
   0x5   : > { %s35_s23 = sadd.s32 1, %s1009_s16  ;;  %p859_p5 = scmp.ge.s32.totalorder %s1021_s19, 2 }
   0x6   : > { %s1183_s20 = smov (%p28_p0, %s26_s20), 0  ;;  %p1082_p3 = por %p43_p2, %p42_p1 }
   0x7   : > { %s30_s22 = ssub.s32 %s1017_s18, %s1183_s20  ;;  %182 = sbr.rel (%p859_p5) target bundleno = 30 (0x1e), region = 16 }
   0x8   : > { %p33_p4 = scmp.eq.s32.totalorder %s30_s22, 0 }
   0xa   : > { %s1090_s24 = scalar_select %p33_p4, %s1009_s16, %s35_s23  }
   0xc   : > { %185 = sbr.rel (!%p1082_p3) target bundleno = 18 (0x12), region = 20  ;;  %s187_s25 = sand.u32 (%p1082_p3), 1, %s1009_s16  }
   0xd   : > { %s921_s26 = smul.u32 (%p1082_p3), 24, %s1017_s18  ;;  %s860_s27 = sshll.u32 (%p1082_p3), %s187_s25, 3 }
   0xe   : > { %s189_s5 = scalar_lea.vmem (%p1082_p3), [#allocation2], %s860_s27 }
   0xf   : > { %s193_s30 = scalar_lea.vmem (%p1082_p3), %s1172_s0, %s921_s26 }
  0x10   : > { %v210_v0 = vld [vmem:[%s193_s30] sm:$0xf] (%p1082_p3)  ;;  %v212_v1 = vld [vmem:[%s193_s30 + $0xc] sm:$0xf] (%p1082_p3) }
  0x11   : > { %211 = vst [vmem:[%s189_s5] sm:$0xf] %v210_v0  ;;  %213 = vst [vmem:[%s189_s5 + $0x4] sm:$0xf] %v212_v1 }
  0x12 PF: > { %241 = sbr.rel (!%p1082_p3) target bundleno = 24 (0x18), region = 61  ;;  %s243_s6 = sand.u32 (%p1082_p3), 1, %s1009_s16  }
  0x13   : > { %s863_s7 = smul.u32 (%p1082_p3), 24, %s1017_s18  ;;  %s862_s8 = sshll.u32 (%p1082_p3), %s243_s6, 3 }
  0x14   : > { %s245_s12 = scalar_lea.vmem (%p1082_p3), [#allocation3], %s862_s8 }
  0x15   : > { %s758_s11 = scalar_lea.vmem (%p1082_p3), %s1173_s1, %s863_s7 }
  0x16   : > { %v864_v2 = vld [vmem:[%s758_s11 + $0x4] sm:$0xf] (%p1082_p3)  ;;  %v865_v3 = vld [vmem:[%s758_s11 + $0x10] sm:$0xf] (%p1082_p3) }
  0x17   : > { %268 = vst [vmem:[%s245_s12] sm:$0xf] %v864_v2  ;;  %270 = vst [vmem:[%s245_s12 + $0x4] sm:$0xf] %v865_v3 }
  0x18 PF: > { %298 = sbr.rel (!%p1082_p3) target bundleno = 30 (0x1e), region = 102  ;;  %s300_s13 = sand.u32 (%p1082_p3), 1, %s1009_s16  }
  0x19   : > { %s867_s14 = smul.u32 (%p1082_p3), 24, %s1017_s18  ;;  %s866_s22 = sshll.u32 (%p1082_p3), %s300_s13, 3 }
  0x1a   : > { %s302_s27 = scalar_lea.vmem (%p1082_p3), [#allocation4], %s866_s22 }
  0x1b   : > { %s765_s26 = scalar_lea.vmem (%p1082_p3), %s1174_s2, %s867_s14 }
  0x1c   : > { %v868_v4 = vld [vmem:[%s765_s26 + $0x8] sm:$0xf] (%p1082_p3)  ;;  %v869_v5 = vld [vmem:[%s765_s26 + $0x14] sm:$0xf] (%p1082_p3) }
  0x1d   : > { %325 = vst [vmem:[%s302_s27] sm:$0xf] %v868_v4  ;;  %327 = vst [vmem:[%s302_s27 + $0x4] sm:$0xf] %v869_v5 }
  0x1e PF: > { %p870_p6 = scmp.ge.s32.totalorder %s1021_s19, 1  ;;  %p360_p7 = scmp.lt.s32.totalorder %s1021_s19, 3 }
  0x20   : > { %p361_p8 = pnand %p870_p6, %p360_p7 }
  0x21   : > { %s367_s21 = sand.u32 (!%p361_p8), 1, %s1005_s15   ;;  %s1025_s15 = smov (!%p361_p8), 64  }
  0x22   : > { %364 = sbr.rel (%p361_p8) target bundleno = 1093 (0x445), region = 147  ;;  %s1117_s28 = sshll.u32 (!%p361_p8), %s367_s21, 3 }
  0x23   : > { %s376_s29 = scalar_lea.vmem (!%p361_p8), [#allocation3], %s1117_s28  ;;  %s369_s30 = scalar_lea.vmem (!%p361_p8), [#allocation2], %s1117_s28 }
  0x24   : > { %p422_p9 = scmp.lt.s32.totalorder (!%p361_p8), %s1013_s17, 1  ;;  %s383_s8 = scalar_lea.vmem (!%p361_p8), [#allocation4], %s1117_s28 }
  0x27   : > { %v1023_v6 = vmov 0.0   ;;  %vm1024_vm0 = vmmov 0   ;;  %vm460_vm1 = vcmask 523264   ;;  %v965_v7 = vld [vmem:[%s376_s29] sm:$0xff]   ;;  %v436_v8 = vld [vmem:[%s369_s30] sm:$0xf] }
  0x28   : > { %897 = vmatprep.subr.bf16.mxu0 %v1023_v6  ;;  %899 = vmatprep.mubr.msk.bf16.mxu0 %vm1024_vm0, %v1023_v6  ;;  %v437_v9 = vld [vmem:[%s369_s30 + $0x4] sm:$0xf]  ;;  %v465_v10 = vsel %vm460_vm1, %v965_v7, 0  ;;  %v442_v11 = vmul.bf16 1040203264, %v436_v8  ;;  %s1185_s17 = smov (!%p422_p9, %s1013_s17), 1 }
  0x29   : > { %903 = vmatprep.subr.bf16.mxu1 %v1023_v6  ;;  %905 = vmatprep.mubr.msk.bf16.mxu1 %vm1024_vm0, %v1023_v6  ;;  %v443_v12 = vmul.bf16 1040203264, %v437_v9  ;;  %s424_s7 = scalar_lea.vmem %s1175_s3, %s1185_s17  ;;  %vm508_vm2 = vcmask 130048   ;;  %v966_v23 = vld [vmem:[%s383_s8] sm:$0xff]   ;;  %s888_s9 = sshll.u32 %s1185_s17, 3 }
  0x2a   : > { %898 = vmatpush3.bf16.xpose.msra.mxu0 %v465_v10  ;;  %585 = vrot.lane.b32.xlu1 %v965_v7, %s1025_s15  ;;  %v876_v14 = vld [vmem:[%s424_s7] ss:$0 sm:$0xff]  ;;  %s432_s12 = scalar_lea.vmem %s1176_s4, %s888_s9 }
  0x2b   : > { %915 = vmatprep.subr.bf16.mxu0 %v1023_v6  ;;  %v877_v13 = vcombine.low %v442_v11, %v443_v12  ;;  %904 = vmatpush3.bf16.msra.mxu1 %v966_v23 }
  0x2c   : > { %909 = vmatprep.subr.bf16.mxu1 %v1023_v6 }
  0x2e   : > { %583 = vrot.lane.b32.xlu1 %v877_v13, %s1025_s15 }
  0x31   : > { %900 = vmatmul.mubr.msk.bf16.vlgmr.msra.gmra.mxu0 %vm460_vm1, %v877_v13 }
  0x32   : > { %917 = vmatprep.mubr.msk.bf16.mxu0 %vm1024_vm0, %v1023_v6 }
  0x9c   : > { %v586_v30 = vpop.permute.xlu1 %585 }
  0x9d   : > { %v591_v33 = vsel %vm460_vm1, %v586_v30, 0 }
  0xa0   : > { %v584_v35 = vpop.permute.xlu1 %583 }
  0xf1   : > { %v501_v15 = vpop.f32.mrf.mxu0 }
  0xf2   : > { %v502_v16 = vadd.f32 %v876_v14, %v501_v15 }
  0xf3   : > { %v901_v17 = vpop.f32.mrf.mxu0 }
  0xf4   : > { %v509_v18 = vsel %vm508_vm2, %v502_v16, -inf }
  0xf5   : > { %510 = vmax.xlane.f32.xlu0 %v509_v18  ;;  %v504_v19 = vpop.f32.mrf.mxu0 }
  0xf6   : > { %v505_v20 = vadd.f32 %v876_v14, %v504_v19 }
  0xf7   : > { %v902_v21 = vpop.f32.mrf.mxu0 }
  0xf8   : > { %v512_v22 = vsel %vm508_vm2, %v505_v20, -inf }
  0xf9   : > { %513 = vmax.xlane.f32.xlu0 %v512_v22 }
 0x17e   : > { %v511_v24 = vpop.xlane.xlu0 %510 }
 0x17f   : > { %v515_v25 = vsub.f32 %v502_v16, %v511_v24 }
 0x181   : > { %v517_v26 = vmul.f32 1.442695, %v515_v25 }
 0x182   : > { %v514_v27 = vpop.xlane.xlu0 %513 }
 0x183   : > { %v516_v28 = vsub.f32 %v505_v20, %v514_v27  ;;  %967 = vpow2.f32 %v517_v26 }
 0x185   : > { %v519_v29 = vmul.f32 1.442695, %v516_v28 }
 0x187   : > { %969 = vpow2.f32 %v519_v29 }
 0x190   : > { %v968_v31 = vpop.eup %967 }
 0x191   : > { %v521_v60 = vsel %vm508_vm2, %v968_v31, 0.0 }
 0x194   : > { %v970_v32 = vpop.eup %969 }
 0x195   : > { %v529_v34 = vpack.c.bf16 %v970_v32, %v968_v31  ;;  %v524_v61 = vsel %vm508_vm2, %v970_v32, 0.0 }
 0x197   : > { %906 = vmatmul.mubr.msk.bf16.vlgmr.msra.gmra.mxu1 %vm508_vm2, %v529_v34 }
 0x198   : > { %910 = vmatpush3.bf16.xpose.msra.mxu1 %v591_v33  ;;  %911 = vmatprep.mubr.msk.bf16.mxu1 %vm1024_vm0, %v1023_v6 }
 0x19f   : > { %912 = vmatmul.mubr.msk.bf16.vlgmr.msra.gmra.mxu1 %vm460_vm1, %v584_v35 }
 0x257   : > { %v573_v36 = vpop.f32.mrf.mxu1 }
 0x259   : > { %v907_v37 = vpop.f32.mrf.mxu1 }
 0x25b   : > { %v576_v38 = vpop.f32.mrf.mxu1 }
 0x25d   : > { %v908_v39 = vpop.f32.mrf.mxu1 }
 0x25f   : > { %v627_v40 = vpop.f32.mrf.mxu1 }
 0x260   : > { %v628_v41 = vadd.f32 %v876_v14, %v627_v40 }
 0x261   : > { %v913_v42 = vpop.f32.mrf.mxu1 }
 0x262   : > { %v634_v43 = vsel %vm508_vm2, %v628_v41, -inf }
 0x263   : > { %635 = vmax.xlane.f32.xlu0 %v634_v43  ;;  %v630_v44 = vpop.f32.mrf.mxu1 }
 0x264   : > { %v631_v45 = vadd.f32 %v876_v14, %v630_v44 }
 0x265   : > { %v914_v46 = vpop.f32.mrf.mxu1 }
 0x266   : > { %v637_v47 = vsel %vm508_vm2, %v631_v45, -inf }
 0x267   : > { %638 = vmax.xlane.f32.xlu1 %v637_v47 }
 0x279   : > { %655 = vrot.lane.b32.xlu0 %v966_v23, %s1025_s15 }
 0x2ec   : > { %v636_v48 = vpop.xlane.xlu0 %635 }
 0x2ed   : > { %v640_v49 = vsub.f32 %v628_v41, %v636_v48 }
 0x2ef   : > { %v642_v50 = vmul.f32 1.442695, %v640_v49 }
 0x2f0   : > { %v639_v51 = vpop.xlane.xlu1 %638  ;;  %v656_v52 = vpop.permute.xlu0 %655 }
 0x2f1   : > { %971 = vpow2.f32 %v642_v50  ;;  %v641_v53 = vsub.f32 %v631_v45, %v639_v51  ;;  %916 = vmatpush3.bf16.msra.mxu0 %v656_v52 }
 0x2f3   : > { %v644_v54 = vmul.f32 1.442695, %v641_v53 }
 0x2f5   : > { %973 = vpow2.f32 %v644_v54 }
 0x2fe   : > { %v972_v55 = vpop.eup %971 }
 0x2ff   : > { %v646_v56 = vsel %vm508_vm2, %v972_v55, 0.0 }
 0x300   : > { %647 = vadd.xlane.f32.xlu0 %v646_v56 }
 0x302   : > { %v974_v57 = vpop.eup %973 }
 0x303   : > { %v649_v58 = vsel %vm508_vm2, %v974_v57, 0.0  ;;  %v654_v59 = vpack.c.bf16 %v974_v57, %v972_v55 }
 0x304   : > { %650 = vadd.xlane.f32.xlu1 %v649_v58 }
 0x305   : > { %918 = vmatmul.mubr.msk.bf16.vlgmr.msra.gmra.mxu0 %vm508_vm2, %v654_v59 }
 0x308   : > { %522 = vadd.xlane.f32.xlu1 %v521_v60 }
 0x30c   : > { %525 = vadd.xlane.f32.xlu1 %v524_v61 }
 0x389   : > { %v648_v62 = vpop.xlane.xlu0 %647 }
 0x38a   : > { %975 = vrcp.f32 %v648_v62 }
 0x38d   : > { %v651_v63 = vpop.xlane.xlu1 %650 }
 0x38e   : > { %977 = vrcp.f32 %v651_v63 }
 0x391   : > { %v523_v9 = vpop.xlane.xlu1 %522 }
 0x395   : > { %v526_v10 = vpop.xlane.xlu1 %525 }
 0x396   : > { %979 = vrcp.f32 %v526_v10 }
 0x397   : > { %v976_v2 = vpop.eup %975  ;;  %981 = vrcp.f32 %v523_v9 }
 0x39b   : > { %v978_v3 = vpop.eup %977 }
 0x3a3   : > { %v980_v11 = vpop.eup %979 }
 0x3a4   : > { %v982_v12 = vpop.eup %981  ;;  %v581_v13 = vmul.f32 %v980_v11, %v576_v38 }
 0x3a5   : > { %v580_v14 = vmul.f32 %v982_v12, %v573_v36 }
 0x3a7   : > { %v582_v15 = vpack.c.bf16 %v581_v13, %v580_v14 }
 0x3c5   : > { %v695_v0 = vpop.f32.mrf.mxu0 }
 0x3c6   : > { %v702_v5 = vmul.f32 %v976_v2, %v695_v0 }
 0x3c7   : > { %v919_v1 = vpop.f32.mrf.mxu0 }
 0x3c9   : > { %v698_v4 = vpop.f32.mrf.mxu0 }
 0x3ca   : > { %v703_v6 = vmul.f32 %v978_v3, %v698_v4 }
 0x3cb   : > { %v920_v7 = vpop.f32.mrf.mxu0 }
 0x3cc   : > { %v704_v8 = vpack.c.bf16 %v703_v6, %v702_v5 }
 0x3ce   : > { %706 = vrot.lane.b32.xlu1 %v704_v8, %s1025_s15 }
 0x440   : > { %v707_v16 = vpop.permute.xlu1 %706 }
 0x441   : > { %v710_v17 = vsel %vm460_vm1, %v582_v15, %v707_v16 }
 0x442   : > { %v884_v18 = vcombine.low %v710_v17, %v710_v17  ;;  %v885_v19 = vcombine.high %v710_v17, %v710_v17 }
 0x444   : > { %718 = vst [vmem:[%s432_s12] sm:$0xf] %v884_v18  ;;  %719 = vst [vmem:[%s432_s12 + $0x4] sm:$0xf] %v885_v19 }
 0x445 PF: > { %s14_s19 = sadd.s32 1, %s1021_s19   ;;  %s1178_s15 = smov %s1009_s16 }
 0x446   : > { %p11_p10 = scmp.ge.s32.totalorder %s14_s19, 4   ;;  %s1179_s16 = smov %s1090_s24 }
 0x447   : > { %s1180_s17 = smov %s1017_s18  ;;  %s1181_s18 = smov %s1183_s20 }
 0x448   :  { %13 = sbr.rel (!%p11_p10) target bundleno = 3 (0x3), region = 213 }

// kernel: layoutlm_encoder.11
= control target key start
LH: loop header
LB: loop body
LE: loop exit
PB: predicated region body
PF: predicated region fallthrough
CT: control target
= control target key end

     0   :  { %s957_s24 = smov 0   ;;  %s1094_s0 = inlined_call_operand.vmem [shape: bf16[32,128], index: 0, kind: input, shape index: {}]   ;;  %s1095_s1 = inlined_call_operand.vmem [shape: bf16[128,256], index: 1, kind: input, shape index: {}]   ;;  %s1096_s2 = inlined_call_operand.vmem [shape: f32[1,256], index: 2, kind: input, shape index: {}]   ;;  %s1097_s3 = inlined_call_operand.vmem [shape: bf16[256,128], index: 3, kind: input, shape index: {}]   ;;  %s1098_s4 = inlined_call_operand.vmem [shape: f32[1,128], index: 4, kind: input, shape index: {}]   ;;  %s1099_s5 = inlined_call_operand.vmem [shape: f32[1,128], index: 5, kind: input, shape index: {}]   ;;  %s1100_s6 = inlined_call_operand.vmem [shape: f32[1,128], index: 6, kind: input, shape index: {}]   ;;  %s1101_s7 = inlined_call_operand.vmem [shape: bf16[32,128], index: 7, kind: output, shape index: {}]  }
   0x1 LB: > { %s767_s25 = sadd.s32 4294967295, %s914_s24   ;;  %p771_p0 = scmp.ge.s32.totalorder %s914_s24, 1  ;;  %s914_s24 = sphi %s957_s24, %s17_s24  }
   0x2   : > { %p238_p1 = scmp.lt.s32.totalorder %s914_s24, 3 }
   0x4   : > { %p239_p2 = pnand %p771_p0, %p238_p1 }
   0x5   : > { %s772_s28 = sshll.u32 (!%p239_p2), %s767_s25, 1 }
   0x6   : > { %242 = sbr.rel (%p239_p2) target bundleno = 790 (0x316), region = 48  ;;  %p271_p3 = scmp.lt.s32.totalorder (!%p239_p2), %s772_s28, 3 }
   0xb   : > { %v854_v0 = vld [vmem:[%s1095_s1 + $0x74] ss:$8 sps:$4 sm:$0xff]   ;;  %v856_v1 = vld [vmem:[%s1095_s1 + $0x70] ss:$8 sps:$4 sm:$0xff]   ;;  %v916_v2 = vmov 0   ;;  %s1103_s28 = smov (!%p271_p3, %s772_s28), 3  ;;  %v303_v34 = vlaneseq }
   0xc   : > { %431 = vmatprep.mubr.bf16.mxu0 %v916_v2  ;;  %399 = vmatprep.subr.bf16.mxu0 %v854_v0  ;;  %v857_v3 = vld [vmem:[%s1095_s1 + $0x64] ss:$8 sps:$4 sm:$0xff]   ;;  %v859_v4 = vld [vmem:[%s1095_s1 + $0x60] ss:$8 sps:$4 sm:$0xff]   ;;  %v860_v5 = vld [vmem:[%s1095_s1 + $0x54] ss:$8 sps:$4 sm:$0xff]  }
   0xd   : > { %400 = vmatpush1.bf16.msra.mxu0 %v856_v1  ;;  %v862_v6 = vld [vmem:[%s1095_s1 + $0x50] ss:$8 sps:$4 sm:$0xff]   ;;  %v863_v7 = vld [vmem:[%s1095_s1 + $0x44] ss:$8 sps:$4 sm:$0xff]   ;;  %v865_v8 = vld [vmem:[%s1095_s1 + $0x40] ss:$8 sps:$4 sm:$0xff]  }
   0xe   : > { %401 = vmatprep.subr.bf16.mxu0 %v857_v3  ;;  %s773_s20 = sshll.u32 %s1103_s28, 2  ;;  %v866_v9 = vld [vmem:[%s1095_s1 + $0x34] ss:$8 sps:$4 sm:$0xff]   ;;  %v868_v10 = vld [vmem:[%s1095_s1 + $0x30] ss:$8 sps:$4 sm:$0xff]   ;;  %v883_v22 = vld [vmem:[%s1097_s3 + $0x68] sm:$0xff]  }
   0xf   : > { %v869_v11 = vld [vmem:[%s1095_s1 + $0x24] ss:$8 sps:$4 sm:$0xff]   ;;  %v871_v12 = vld [vmem:[%s1095_s1 + $0x20] ss:$8 sps:$4 sm:$0xff]   ;;  %v872_v13 = vld [vmem:[%s1095_s1 + $0x14] ss:$8 sps:$4 sm:$0xff]   ;;  %s274_s16 = scalar_lea.vmem %s1094_s0, %s773_s20  ;;  %s280_s22 = scalar_lea.vmem %s1101_s7, %s773_s20 }
  0x10   : > { %v874_v14 = vld [vmem:[%s1095_s1 + $0x10] ss:$8 sps:$4 sm:$0xff]   ;;  %v875_v15 = vld [vmem:[%s1095_s1 + $0x4] ss:$8 sps:$4 sm:$0xff]   ;;  %v877_v16 = vld [vmem:[%s1095_s1] ss:$8 sps:$4 sm:$0xff]  }
  0x11   : > { %402 = vmatpush1.bf16.msra.mxu0 %v859_v4  ;;  %v1021_v17 = vld [vmem:[%s274_s16] sm:$0xff]   ;;  %v879_v18 = vld [vmem:[%s1097_s3 + $0x78] sm:$0xff]   ;;  %v881_v20 = vld [vmem:[%s1097_s3 + $0x70] sm:$0xff]   ;;  %v304_v35 = vshrl.u32 %v303_v34, 7 }
  0x12   : > { %403 = vmatprep.subr.bf16.mxu0 %v860_v5  ;;  %v880_v19 = vld [vmem:[%s1097_s3 + $0x38] sm:$0xff]   ;;  %823 = vmatprep.subr.bf16.mxu1 %v879_v18  ;;  %v882_v21 = vld [vmem:[%s1097_s3 + $0x30] sm:$0xff]   ;;  %v884_v23 = vld [vmem:[%s1097_s3 + $0x28] sm:$0xff]   ;;  %v657_v34 = vunpack.c.h.bf16 %v1021_v17 }
  0x13   : > { %824 = vmatpush3.bf16.msra.mxu1 %v880_v19  ;;  %v885_v24 = vld [vmem:[%s1097_s3 + $0x60] sm:$0xff]   ;;  %v887_v26 = vld [vmem:[%s1097_s3 + $0x58] sm:$0xff]   ;;  %v889_v28 = vld [vmem:[%s1097_s3 + $0x50] sm:$0xff]   ;;  %v305_v36 = vsub.s32 0, %v304_v35  ;;  %v309_v38 = vsub.s32 1, %v304_v35 }
  0x14   : > { %825 = vmatprep.subr.bf16.mxu1 %v881_v20  ;;  %v886_v25 = vld [vmem:[%s1097_s3 + $0x20] sm:$0xff]   ;;  %v888_v27 = vld [vmem:[%s1097_s3 + $0x18] sm:$0xff]   ;;  %v890_v29 = vld [vmem:[%s1097_s3 + $0x10] sm:$0xff]  }
  0x15   : > { %404 = vmatpush1.bf16.msra.mxu0 %v862_v6  ;;  %v891_v30 = vld [vmem:[%s1097_s3 + $0x48] sm:$0xff]   ;;  %v893_v32 = vld [vmem:[%s1097_s3 + $0x40] sm:$0xff]  }
  0x16   : > { %405 = vmatprep.subr.bf16.mxu0 %v863_v7  ;;  %v892_v31 = vld [vmem:[%s1097_s3 + $0x8] sm:$0xff]   ;;  %v894_v33 = vld [vmem:[%s1097_s3] sm:$0xff]  }
  0x17   : > { %826 = vmatpush3.bf16.msra.mxu1 %v882_v21  ;;  %v301_v37 = vld [vmem:[%s1096_s2] sm:$0x3] }
  0x18   : > { %827 = vmatprep.subr.bf16.mxu1 %v883_v22  ;;  %v306_v39 = vrot.slane %v301_v37, %v305_v36  ;;  %v310_v40 = vrot.slane %v301_v37, %v309_v38 }
  0x19   : > { %406 = vmatpush1.bf16.msra.mxu0 %v865_v8 }
  0x1a   : > { %407 = vmatprep.subr.bf16.mxu0 %v866_v9 }
  0x1b   : > { %828 = vmatpush3.bf16.msra.mxu1 %v884_v23 }
  0x1c   : > { %829 = vmatprep.subr.bf16.mxu1 %v885_v24 }
  0x1d   : > { %408 = vmatpush1.bf16.msra.mxu0 %v868_v10 }
  0x1e   : > { %409 = vmatprep.subr.bf16.mxu0 %v869_v11 }
  0x1f   : > { %830 = vmatpush3.bf16.msra.mxu1 %v886_v25  ;;  %v793_v25 = vld [vmem:[%s1098_s4] ss:$0 sm:$0xff] }
  0x20   : > { %831 = vmatprep.subr.bf16.mxu1 %v887_v26 }
  0x21   : > { %410 = vmatpush1.bf16.msra.mxu0 %v871_v12 }
  0x22   : > { %411 = vmatprep.subr.bf16.mxu0 %v872_v13 }
  0x23   : > { %832 = vmatpush3.bf16.msra.mxu1 %v888_v27 }
  0x24   : > { %833 = vmatprep.subr.bf16.mxu1 %v889_v28  ;;  %v656_v28 = vunpack.c.l.bf16 %v1021_v17 }
  0x25   : > { %412 = vmatpush1.bf16.msra.mxu0 %v874_v14 }
  0x26   : > { %413 = vmatprep.subr.bf16.mxu0 %v875_v15 }
  0x27   : > { %834 = vmatpush3.bf16.msra.mxu1 %v890_v29 }
  0x28   : > { %835 = vmatprep.subr.bf16.mxu1 %v891_v30 }
  0x29   : > { %414 = vmatpush1.bf16.msra.mxu0 %v877_v16 }
  0x2b   : > { %836 = vmatpush3.bf16.msra.mxu1 %v892_v31 }
  0x2c   : > { %432 = vmatmul.mubr.bf16.vlgmr.msra.gmra.mxu0 %v1021_v17  ;;  %837 = vmatprep.subr.bf16.mxu1 %v893_v32 }
  0x2f   : > { %838 = vmatpush3.bf16.msra.mxu1 %v894_v33 }
  0xec   : > { %v433_v41 = vpop.f32.mrf.mxu0 }
  0xed   : > { %v434_v42 = vadd.f32 %v433_v41, %v306_v39 }
  0xee   : > { %v435_v43 = vpop.f32.mrf.mxu0 }
  0xef   : > { %v446_v44 = vmul.f32 0.044715, %v434_v42  ;;  %v436_v45 = vadd.f32 %v435_v43, %v310_v40  ;;  %v442_v16 = vmul.f32 0.5, %v434_v42 }
  0xf0   : > { %v437_v46 = vpop.f32.mrf.mxu0 }
  0xf1   : > { %v450_v47 = vmul.f32 %v446_v44, %v434_v42  ;;  %v447_v48 = vmul.f32 0.044715, %v436_v45  ;;  %v438_v49 = vadd.f32 %v437_v46, %v306_v39  ;;  %v443_v13 = vmul.f32 0.5, %v436_v45 }
  0xf2   : > { %v439_v50 = vpop.f32.mrf.mxu0 }
  0xf3   : > { %v454_v51 = vmul.f32 %v450_v47, %v434_v42  ;;  %v448_v52 = vmul.f32 0.044715, %v438_v49  ;;  %v440_v53 = vadd.f32 %v439_v50, %v310_v40  ;;  %v451_v54 = vmul.f32 %v447_v48, %v436_v45 }
  0xf4   : > { %v444_v11 = vmul.f32 0.5, %v438_v49 }
  0xf5   : > { %v452_v55 = vmul.f32 %v448_v52, %v438_v49  ;;  %v449_v56 = vmul.f32 0.044715, %v440_v53  ;;  %v455_v57 = vmul.f32 %v451_v54, %v436_v45  ;;  %v458_v58 = vadd.f32 %v454_v51, %v434_v42  ;;  %v810_v52 = vld [vmem:[%s1099_s5] ss:$0 sm:$0xff] }
  0xf6   : > { %v445_v14 = vmul.f32 0.5, %v440_v53 }
  0xf7   : > { %v456_v59 = vmul.f32 %v452_v55, %v438_v49  ;;  %v453_v60 = vmul.f32 %v449_v56, %v440_v53  ;;  %v459_v61 = vadd.f32 %v455_v57, %v436_v45  ;;  %v462_v62 = vmul.f32 0.7978846, %v458_v58  ;;  %v811_v56 = vld [vmem:[%s1100_s6] ss:$0 sm:$0xff] }
  0xf9   : > { %v457_v63 = vmul.f32 %v453_v60, %v440_v53  ;;  %v463_v0 = vmul.f32 0.7978846, %v459_v61  ;;  %v460_v1 = vadd.f32 %v456_v59, %v438_v49 }
  0xfb   : > { %v461_v2 = vadd.f32 %v457_v63, %v440_v53  ;;  %896 = vtanh.f32 %v463_v0  ;;  %v464_v3 = vmul.f32 0.7978846, %v460_v1 }
  0xfc   : > { %898 = vtanh.f32 %v462_v62 }
  0xfd   : > { %v465_v4 = vmul.f32 0.7978846, %v461_v2  ;;  %900 = vtanh.f32 %v464_v3 }
  0xff   : > { %902 = vtanh.f32 %v465_v4 }
 0x108   : > { %v897_v5 = vpop.eup %896 }
 0x109   : > { %v899_v6 = vpop.eup %898  ;;  %v471_v8 = vadd.f32 1.0, %v897_v5 }
 0x10a   : > { %v901_v7 = vpop.eup %900  ;;  %v470_v12 = vadd.f32 1.0, %v899_v6 }
 0x10b   : > { %v472_v9 = vadd.f32 1.0, %v901_v7  ;;  %v475_v19 = vmul.f32 %v471_v8, %v443_v13 }
 0x10c   : > { %v903_v10 = vpop.eup %902  ;;  %v474_v21 = vmul.f32 %v470_v12, %v442_v16 }
 0x10d   : > { %v473_v15 = vadd.f32 1.0, %v903_v10  ;;  %v476_v18 = vmul.f32 %v472_v9, %v444_v11 }
 0x10f   : > { %v477_v20 = vmul.f32 %v473_v15, %v445_v14  ;;  %v478_v23 = vpack.c.bf16 %v476_v18, %v474_v21 }
 0x111   : > { %v479_v22 = vpack.c.bf16 %v477_v20, %v475_v19 }
 0x113   : > { %647 = vmatprep.mubr.bf16.mxu1 %v479_v22 }
 0x114   : > { %648 = vmatmul.mubr.bf16.vlgmr.msra.gmra.mxu1 %v478_v23 }
 0x1d4   : > { %v839_v24 = vpop.f32.mrf.mxu1 }
 0x1d6   : > { %v840_v26 = vpop.f32.mrf.mxu1 }
 0x1d7   : > { %v841_v27 = vadd.f32 %v840_v26, %v839_v24 }
 0x1d8   : > { %v842_v29 = vpop.f32.mrf.mxu1 }
 0x1d9   : > { %v650_v30 = vadd.f32 %v841_v27, %v793_v25 }
 0x1da   : > { %v843_v31 = vpop.f32.mrf.mxu1 }
 0x1db   : > { %v844_v32 = vadd.f32 %v843_v31, %v842_v29  ;;  %v658_v33 = vadd.f32 %v656_v28, %v650_v30 }
 0x1dd   : > { %v653_v35 = vadd.f32 %v844_v32, %v793_v25  ;;  %662 = vadd.xlane.f32.xlu0 %v658_v33 }
 0x1df   : > { %v659_v36 = vadd.f32 %v657_v34, %v653_v35 }
 0x1e1   : > { %664 = vadd.xlane.f32.xlu0 %v659_v36 }
 0x266   : > { %v663_v37 = vpop.xlane.xlu0 %662 }
 0x267   : > { %v667_v38 = vmul.f32 0.0078125, %v663_v37 }
 0x269   : > { %v669_v39 = vsub.f32 %v658_v33, %v667_v38 }
 0x26a   : > { %v665_v40 = vpop.xlane.xlu0 %664 }
 0x26b   : > { %v668_v41 = vmul.f32 0.0078125, %v665_v40  ;;  %v671_v42 = vmul.f32 %v669_v39, %v669_v39 }
 0x26d   : > { %v670_v43 = vsub.f32 %v659_v36, %v668_v41  ;;  %673 = vadd.xlane.f32.xlu1 %v671_v42 }
 0x26f   : > { %v672_v44 = vmul.f32 %v670_v43, %v670_v43 }
 0x271   : > { %675 = vadd.xlane.f32.xlu1 %v672_v44 }
 0x2f6   : > { %v674_v45 = vpop.xlane.xlu1 %673 }
 0x2f7   : > { %v677_v46 = vmul.f32 0.0078125, %v674_v45 }
 0x2f9   : > { %v679_v47 = vadd.f32 1e-12, %v677_v46 }
 0x2fa   : > { %v676_v48 = vpop.xlane.xlu1 %675 }
 0x2fb   : > { %904 = vrsqrt.f32 %v679_v47  ;;  %v678_v17 = vmul.f32 0.0078125, %v676_v48 }
 0x2fd   : > { %v680_v49 = vadd.f32 1e-12, %v678_v17 }
 0x2ff   : > { %906 = vrsqrt.f32 %v680_v49 }
 0x308   : > { %v905_v50 = vpop.eup %904 }
 0x309   : > { %v683_v51 = vmul.f32 %v905_v50, %v669_v39 }
 0x30b   : > { %v691_v54 = vmul.f32 %v810_v52, %v683_v51 }
 0x30c   : > { %v907_v53 = vpop.eup %906 }
 0x30d   : > { %v684_v55 = vmul.f32 %v907_v53, %v670_v43  ;;  %v699_v58 = vadd.f32 %v811_v56, %v691_v54 }
 0x30f   : > { %v692_v57 = vmul.f32 %v810_v52, %v684_v55 }
 0x311   : > { %v700_v59 = vadd.f32 %v811_v56, %v692_v57 }
 0x313   : > { %v821_v60 = vpack.c.bf16 %v700_v59, %v699_v58 }
 0x315   : > { %822 = vst [vmem:[%s280_s22] sm:$0xff] %v821_v60  }
 0x316 PF: > { %s17_s24 = sadd.s32 1, %s914_s24  }
 0x317   : > { %p14_p4 = scmp.ge.s32.totalorder %s17_s24, 4  }
 0x319   :  { %16 = sbr.rel (!%p14_p4) target bundleno = 1 (0x1), region = 78 }

</bundles_post_ra>
